<compile_context>
chip_gen: v7x
topology: tpu7x:2x2x1
jax: 0.10.0
libtpu: 0.0.40
codegen_flags: <defaults>
</compile_context>

<pallas_src>
import math
import functools

import numpy as np
import jax
import jax.numpy as jnp
from jax import lax
from jax.experimental import pallas as pl
from jax.experimental.pallas import tpu as pltpu


# ---------------------------------------------------------------------------
# Constant patch-pooling matrix: maps the Q = T_p*H_lat*W_lat latent elements
# of one token-frame (row-major over (T_p, H_lat, W_lat)) to their spatial
# token s = ht*Wt + wt.  Built host-side from static shapes only.
# ---------------------------------------------------------------------------
def _build_pool_matrix(T_p, H_lat, W_lat, H_p, W_p):
    Ht, Wt = H_lat // H_p, W_lat // W_p
    Q, S = T_p * H_lat * W_lat, Ht * Wt
    q = np.arange(Q)
    w = q % W_lat
    h = (q // W_lat) % H_lat
    s = (h // H_p) * Wt + (w // W_p)
    G = np.zeros((Q, S), dtype=np.float32)
    G[q, s] = 1.0
    return jnp.asarray(G)


# ---------------------------------------------------------------------------
# Kernel: token weights = (1/((K-1)*P)) * patch_sum( sum_C( ssd_K(x) ) )
# ---------------------------------------------------------------------------
def weight_kernel(x_ref, g_ref, w_ref, *, scale):
    # x_ref: (K, C, T_blk, Q) f32  (Q = T_p*H_lat*W_lat, native contiguous order)
    # g_ref: (Q, S) f32 constant 0/1 patch-membership matrix
    # w_ref: (T_blk, S) f32
    x = x_ref[...]
    mu = jnp.mean(x, axis=0, keepdims=True)           # mean over the K window frames
    d = x - mu
    y = jnp.sum(jnp.sum(d * d, axis=0), axis=0)       # sum over K then C -> (T_blk, Q)
    # Patch pooling on the MXU (exact 0/1 sum, HIGHEST precision for f32 accuracy).
    pooled = jnp.dot(y, g_ref[...],
                     preferred_element_type=jnp.float32,
                     precision=lax.Precision.HIGHEST)  # (T_blk, S)
    # deferred divides: ddof=1 variance (K-1) and patch mean (P), fused into one mul
    w_ref[...] = pooled * scale


def _choose_t_blk(T, per_frame_bytes, vmem_budget):
    # T_blk must divide T and be a multiple of 8 (sublane tiling) or equal T.
    cands = [b for b in range(8, T + 1, 8) if T % b == 0]
    if T not in cands:
        cands.append(T)
    fitting = [b for b in cands if 2 * b * per_frame_bytes <= vmem_budget] or [min(cands)]
    multi = [b for b in fitting if T // b >= 2]   # keep >=2 steps for v7x megacore
    return max(multi) if multi else max(fitting)


def token_weights(window, T_p, H_p, W_p):
    K, C, T_lat, H_lat, W_lat = window.shape
    assert K >= 2, "window length must be >= 2 for ddof=1 variance"
    assert T_lat % T_p == 0 and H_lat % H_p == 0 and W_lat % W_p == 0, \
        "latent dims must be divisible by patch sizes"
    T, Ht, Wt = T_lat // T_p, H_lat // H_p, W_lat // W_p
    S, Q, P = Ht * Wt, T_p * H_lat * W_lat, T_p * H_p * W_p

    # Contiguous regrouping only (no transpose / no extra HBM pass).
    # TODO(synk): if upstream latents can be kept in bf16 (v6e/v7x), DMA bf16
    # here and upcast in-kernel to halve HBM read traffic; kept f32 for v5e.
    x4 = window.reshape(K, C, T, Q).astype(jnp.float32)
    G = _build_pool_matrix(T_p, H_lat, W_lat, H_p, W_p)

    per_frame_bytes = K * C * Q * 4
    T_blk = _choose_t_blk(T, per_frame_bytes, vmem_budget=40 * 1024 * 1024)
    grid = (T // T_blk,)

    vmem_need = 2 * T_blk * per_frame_bytes + 2 * Q * S * 4 + 2 * T_blk * S * 4
    vmem_limit = int(min(48 * 1024 * 1024, max(vmem_need + (4 << 20), 16 << 20)))

    scale = 1.0 / float((K - 1) * P)

    out = pl.pallas_call(
        functools.partial(weight_kernel, scale=scale),
        out_shape=jax.ShapeDtypeStruct((T, S), jnp.float32),
        grid=grid,
        in_specs=[
            pl.BlockSpec((K, C, T_blk, Q), lambda i: (0, 0, i, 0)),
            pl.BlockSpec((Q, S), lambda i: (0, 0)),   # constant block: DMA'd once
        ],
        out_specs=pl.BlockSpec((T_blk, S), lambda i: (i, 0)),
        compiler_params=pltpu.CompilerParams(
            dimension_semantics=("parallel",),
            vmem_limit_bytes=vmem_limit,
        ),
    )(x4, G)
    return out


# ---------------------------------------------------------------------------
# Full per-frame filter step (per_frame_filter -> index_filter -> get_update_mask)
# ---------------------------------------------------------------------------
@functools.partial(jax.jit, static_argnums=(1, 2, 3, 4))
def per_frame_filter_step(window, T_p, H_p, W_p, ratio):
    K, C, T_lat, H_lat, W_lat = window.shape
    T, Ht, Wt = T_lat // T_p, H_lat // H_p, W_lat // W_p
    S = Ht * Wt

    weight = token_weights(window, T_p, H_p, W_p)               # (T, S)  Pallas

    # global_select(method='per_frame_largest')
    # TODO(synk): torch.topk tie-breaking may differ from lax.top_k on equal weights.
    n_sel = math.ceil(S * ratio)
    _, s_index = lax.top_k(weight, n_sel)                       # (T, n_sel)
    spatial_index = (jnp.arange(T, dtype=jnp.int32)[:, None] * S
                     + s_index.astype(jnp.int32)).reshape(-1)

    # index_filter(return_type='s_and_t')
    pos_b = spatial_index % S
    pos_a = spatial_index // S
    temp_index = pos_b * T + pos_a

    # get_update_mask(): token one-hot via XLA scatter (a Pallas launch for a
    # (T, S) int mask would be pure dispatch overhead), then the pure
    # broadcast/reshape expansion to the latent grid.
    mask_tok = jnp.zeros((T, S), dtype=jnp.int32).at[
        jnp.arange(T, dtype=jnp.int32)[:, None], s_index].set(1)
    mask = mask_tok.reshape(1, T, 1, Ht, 1, Wt, 1)
    mask = jnp.broadcast_to(mask, (1, T, T_p, Ht, H_p, Wt, W_p))
    mask = mask.reshape(1, T * T_p, Ht * H_p, Wt * W_p)
    mask = mask[:, :T_lat, :H_lat, :W_lat].reshape(1, 1, T_lat, H_lat, W_lat)

    return weight, s_index, temp_index, spatial_index, mask_tok, mask


# ---------------------------------------------------------------------------
# Pure-JAX references
# ---------------------------------------------------------------------------
def reference_weights(window, T_p, H_p, W_p):
    K, C, T_lat, H_lat, W_lat = window.shape
    T, Ht, Wt = T_lat // T_p, H_lat // H_p, W_lat // W_p
    var = jnp.var(window, axis=0, ddof=1)                       # (C, T, H, W)
    y = jnp.sum(var, axis=0)                                    # (T_lat, H, W)
    y = y.reshape(T, T_p, Ht, H_p, Wt, W_p).mean(axis=(1, 3, 5))
    return y.reshape(T, Ht * Wt)


def reference_mask(s_index, T, S):
    m = jnp.zeros((T, S), dtype=jnp.int32)
    return m.at[jnp.arange(T)[:, None], s_index].set(1)


if __name__ == "__main__":
    key = jax.random.PRNGKey(0)

    # Module-consistent small shapes: B=1, C=4, latent (T,H,W)=(8,16,16),
    # patch sizes (2,2,2) -> token grid T=4, S=64 ; window length K=3.
    K, C, T_lat, H_lat, W_lat = 3, 4, 8, 16, 16
    T_p, H_p, W_p = 2, 2, 2
    ratio = 0.25

    window = jax.random.normal(key, (K, C, T_lat, H_lat, W_lat), dtype=jnp.float32)

    (weight, s_index, temp_index, spatial_index,
     mask_tok, mask) = per_frame_filter_step(window, T_p, H_p, W_p, ratio)
    jax.block_until_ready(mask)

    # correctness checks against pure-JAX references
    w_ref = reference_weights(window, T_p, H_p, W_p)
    assert jnp.allclose(weight, w_ref, atol=1e-4, rtol=1e-4), "weight mismatch"

    T, S = weight.shape
    m_ref = reference_mask(s_index, T, S)
    assert jnp.array_equal(mask_tok, m_ref), "token mask mismatch"
    assert int(mask.sum()) == T * s_index.shape[1] * (T_p * H_p * W_p), "latent mask count"
    assert mask.shape == (1, 1, T_lat, H_lat, W_lat)
    assert temp_index.shape == spatial_index.shape

    print("KERNEL_OK")
</pallas_src>

<mosaic_0001>
module attributes {stable_mosaic.version = 11 : i64} {
  func.func @weight_kernel(%arg0: i32, %arg1: memref<3x4x4x512xf32, #tpu.memory_space<vmem>>, %arg2: memref<512x64xf32, #tpu.memory_space<vmem>>, %arg3: memref<4x64xf32, #tpu.memory_space<vmem>>) attributes {dimension_semantics = [#tpu.dimension_semantics<parallel>], iteration_bounds = array<i64: 1>, scalar_prefetch = 0 : i64, scratch_operands = 0 : i64, tpu.core_type = #tpu.core_type<tc>, window_params = [{transform_indices = @transform_0, window_bounds = array<i64: 3, 4, 4, 512>}, {pipeline_mode = #tpu.pipeline_mode<synchronous>, transform_indices = @transform_1, window_bounds = array<i64: 512, 64>}, {transform_indices = @transform_2, window_bounds = array<i64: 4, 64>}]} {
    %c0 = arith.constant 0 : index
    %c0_0 = arith.constant 0 : index
    %c0_1 = arith.constant 0 : index
    %c0_2 = arith.constant 0 : index
    %0 = vector.load %arg1[%c0, %c0_0, %c0_1, %c0_2] : memref<3x4x4x512xf32, #tpu.memory_space<vmem>>, vector<3x4x4x512xf32>
    %cst = arith.constant dense<0.000000e+00> : vector<4x4x512xf32>
    %1 = vector.multi_reduction <add>, %0, %cst [0] : vector<3x4x4x512xf32> to vector<4x4x512xf32>
    %2 = vector.shape_cast %1 : vector<4x4x512xf32> to vector<1x4x4x512xf32>
    %cst_3 = arith.constant 3.000000e+00 : f32
    %3 = vector.broadcast %cst_3 : f32 to vector<1x4x4x512xf32>
    %4 = arith.divf %2, %3 : vector<1x4x4x512xf32>
    %5 = vector.broadcast %4 : vector<1x4x4x512xf32> to vector<3x4x4x512xf32>
    %6 = arith.subf %0, %5 : vector<3x4x4x512xf32>
    %7 = arith.mulf %6, %6 : vector<3x4x4x512xf32>
    %cst_4 = arith.constant dense<0.000000e+00> : vector<4x4x512xf32>
    %8 = vector.multi_reduction <add>, %7, %cst_4 [0] : vector<3x4x4x512xf32> to vector<4x4x512xf32>
    %cst_5 = arith.constant dense<0.000000e+00> : vector<4x512xf32>
    %9 = vector.multi_reduction <add>, %8, %cst_5 [0] : vector<4x4x512xf32> to vector<4x512xf32>
    %c0_6 = arith.constant 0 : index
    %c0_7 = arith.constant 0 : index
    %10 = vector.load %arg2[%c0_6, %c0_7] : memref<512x64xf32, #tpu.memory_space<vmem>>, vector<512x64xf32>
    %cst_8 = arith.constant dense<0.000000e+00> : vector<4x64xf32>
    %11 = tpu.matmul %9, %10, %cst_8 {dimension_numbers = #tpu.dot_dimension_numbers<[1], [0], [0], [1], [0, 0, 1, 1], [], []>, precision = #tpu.contract_precision<fp32>} : vector<4x512xf32>, vector<512x64xf32>, vector<4x64xf32> -> vector<4x64xf32>
    %cst_9 = arith.constant 6.250000e-02 : f32
    %12 = vector.broadcast %cst_9 : f32 to vector<4x64xf32>
    %13 = arith.mulf %11, %12 : vector<4x64xf32>
    %c0_10 = arith.constant 0 : index
    %c0_11 = arith.constant 0 : index
    %14 = vector.load %arg3[%c0_10, %c0_11] : memref<4x64xf32, #tpu.memory_space<vmem>>, vector<4x64xf32>
    tpu.vector_store %arg3[%c0_10, %c0_11], %13 {strides = array<i32>} : memref<4x64xf32, #tpu.memory_space<vmem>>, vector<4x64xf32>,
    return
  }
  func.func @transform_0(%arg0: i32) -> (i32, i32, i32, i32) {
    %c0_i32 = arith.constant 0 : i32
    %c0_i32_0 = arith.constant 0 : i32
    %c0_i32_1 = arith.constant 0 : i32
    %c0_i32_2 = arith.constant 0 : i32
    return %c0_i32, %c0_i32_0, %arg0, %c0_i32_1 : i32, i32, i32, i32
  }
  func.func @transform_1(%arg0: i32) -> (i32, i32) {
    %c0_i32 = arith.constant 0 : i32
    %c0_i32_0 = arith.constant 0 : i32
    %c0_i32_1 = arith.constant 0 : i32
    return %c0_i32, %c0_i32_0 : i32, i32
  }
  func.func @transform_2(%arg0: i32) -> (i32, i32) {
    %c0_i32 = arith.constant 0 : i32
    %c0_i32_0 = arith.constant 0 : i32
    return %arg0, %c0_i32 : i32, i32
  }
}

</mosaic_0001>

<bundles_post_ra>
// kernel: ne.6
= control target key start
LH: loop header
LB: loop body
LE: loop exit
PB: predicated region body
PF: predicated region fallthrough
CT: control target
= control target key end

     0   :  { %s20_s0 = inlined_call_operand.<no memory space> [shape: s32[], index: 0, kind: input, shape index: {}]   ;;  %s21_s1 = inlined_call_operand.vmem [shape: s32[64], index: 1, kind: output, shape index: {}]  }
   0x1   :  { %v2_v0 = vstv %s20_s0 }
   0x2   :  { %3 = vst [vmem:[%s21_s1] sm:$0x1] %v2_v0 }

// kernel: per_frame_filter_step.1
= control target key start
LH: loop header
LB: loop body
LE: loop exit
PB: predicated region body
PF: predicated region fallthrough
CT: control target
= control target key end

     0   :  { %vm107_vm0 = vcmask 1043456   ;;  %vm2254_vm1 = vcmask 519168   ;;  %s4644_s1 = inlined_call_operand.vmem [shape: f32[512,64], index: 1, kind: input, shape index: {}]   ;;  %s4645_s0 = inlined_call_operand.vmem [shape: f32[3,4,4,512], index: 0, kind: input, shape index: {}]   ;;  %s4646_s2 = inlined_call_operand.vmem [shape: f32[4,64], index: 2, kind: output, shape index: {}]  }
   0x1   :  { %v481_v0 = vld [vmem:[%s4644_s1 + $0x80] sm:$0xff]  ;;  %v482_v1 = vld [vmem:[%s4644_s1 + $0x88] sm:$0xff]  ;;  %v483_v7 = vld [vmem:[%s4644_s1 + $0x90] sm:$0xff] }
   0x2   :  { %v465_v2 = vld [vmem:[%s4644_s1] sm:$0xff]  ;;  %v578_v3 = vand.u32 4294901760, %v481_v0  ;;  %v581_v4 = vand.u32 4294901760, %v482_v1  ;;  %v466_v5 = vld [vmem:[%s4644_s1 + $0x8] sm:$0xff]  ;;  %v484_v8 = vld [vmem:[%s4644_s1 + $0x98] sm:$0xff]  ;;  %v584_v10 = vand.u32 4294901760, %v483_v7 }
   0x3   :  { %v530_v6 = vand.u32 4294901760, %v465_v2  ;;  %v533_v9 = vand.u32 4294901760, %v466_v5  ;;  %v587_v11 = vand.u32 4294901760, %v484_v8  ;;  %v467_v12 = vld [vmem:[%s4644_s1 + $0x10] sm:$0xff]  ;;  %v468_v13 = vld [vmem:[%s4644_s1 + $0x18] sm:$0xff]  ;;  %v485_v18 = vld [vmem:[%s4644_s1 + $0xa0] sm:$0xff] }
   0x4   :  { %v3127_v14 = vpack.c.bf16 %v581_v4, %v578_v3  ;;  %v536_v16 = vand.u32 4294901760, %v467_v12  ;;  %v539_v17 = vand.u32 4294901760, %v468_v13  ;;  %v3140_v22 = vsub.f32 %v483_v7, %v584_v10  ;;  %v486_v23 = vld [vmem:[%s4644_s1 + $0xa8] sm:$0xff]  ;;  %v469_v24 = vld [vmem:[%s4644_s1 + $0x20] sm:$0xff]  ;;  %v487_v50 = vld [vmem:[%s4644_s1 + $0xb0] sm:$0xff] }
   0x5   :  { %v3129_v15 = vsub.f32 %v465_v2, %v530_v6  ;;  %v3134_v19 = vpack.c.bf16 %v533_v9, %v530_v6  ;;  %v3136_v20 = vsub.f32 %v466_v5, %v533_v9  ;;  %v3138_v21 = vpack.c.bf16 %v587_v11, %v584_v10  ;;  %v470_v25 = vld [vmem:[%s4644_s1 + $0x28] sm:$0xff]  ;;  %v488_v55 = vld [vmem:[%s4644_s1 + $0xb8] sm:$0xff]  ;;  %v471_v56 = vld [vmem:[%s4644_s1 + $0x30] sm:$0xff] }
   0x6   :  { %4818 = vst [vmem:[#allocation2_spill] sm:$0xff] %v3127_v14  ;;  %2681 = vmatprep.subr.bf16.mxu0 %v3127_v14  ;;  %v3152_v26 = vsub.f32 %v484_v8, %v587_v11  ;;  %v3154_v27 = vpack.c.bf16 %v539_v17, %v536_v16  ;;  %v3156_v28 = vsub.f32 %v467_v12, %v536_v16  ;;  %v590_v34 = vand.u32 4294901760, %v485_v18  ;;  %v489_v16 = vld [vmem:[%s4644_s1 + $0xc0] sm:$0xff] }
   0x7   :  { %4819 = vst [vmem:[#allocation3_spill] sm:$0xff] %v3134_v19  ;;  %4820 = vst [vmem:[#allocation4_spill] sm:$0xff] %v3138_v21  ;;  %v3158_v29 = vsub.f32 %v468_v13, %v539_v17  ;;  %2683 = vmatpush3.bf16.msra.mxu0 %v3134_v19  ;;  %v3161_v30 = vsub.f32 %v481_v0, %v578_v3  ;;  %v3163_v31 = vsub.f32 %v482_v1, %v581_v4  ;;  %v472_v1 = vld [vmem:[%s4644_s1 + $0x38] sm:$0xff] }
   0x8   :  { %4821 = vst [vmem:[#allocation5_spill] sm:$0xff] %v3154_v27  ;;  %v4665_v32 = vand.u32 4294901760, %v3129_v15  ;;  %v4663_v33 = vand.u32 4294901760, %v3136_v20  ;;  %2685 = vmatprep.subr.bf16.mxu0 %v3138_v21  ;;  %v593_v35 = vand.u32 4294901760, %v486_v23  ;;  %v542_v36 = vand.u32 4294901760, %v469_v24 }
   0x9   :  { %v545_v37 = vand.u32 4294901760, %v470_v25  ;;  %v4668_v38 = vand.u32 4294901760, %v3161_v30  ;;  %v4666_v39 = vand.u32 4294901760, %v3163_v31  ;;  %v3178_v43 = vsub.f32 %v485_v18, %v590_v34 }
   0xa   :  { %v645_v40 = vsub.f32 %v3129_v15, %v4665_v32  ;;  %v652_v41 = vsub.f32 %v3136_v20, %v4663_v33  ;;  %v3176_v42 = vpack.c.bf16 %v593_v35, %v590_v34  ;;  %v3180_v44 = vsub.f32 %v486_v23, %v593_v35  ;;  %v473_v34 = vld [vmem:[%s4644_s1 + $0x40] sm:$0xff] }
   0xb   :  { %v3182_v45 = vpack.c.bf16 %v545_v37, %v542_v36  ;;  %2687 = vmatpush3.bf16.msra.mxu0 %v3154_v27  ;;  %v757_v46 = vsub.f32 %v3161_v30, %v4668_v38  ;;  %v764_v47 = vsub.f32 %v3163_v31, %v4666_v39  ;;  %v3195_v51 = vsub.f32 %v469_v24, %v542_v36 }
   0xc   :  { %4822 = vst [vmem:[#allocation6_spill] sm:$0xff] %v3176_v42  ;;  %v646_v48 = vand.u32 4294901760, %v645_v40  ;;  %v653_v49 = vand.u32 4294901760, %v652_v41  ;;  %2689 = vmatprep.subr.bf16.mxu0 %v3176_v42  ;;  %v3197_v52 = vsub.f32 %v470_v25, %v545_v37  ;;  %v4662_v53 = vand.u32 4294901760, %v3140_v22  ;;  %v490_v25 = vld [vmem:[%s4644_s1 + $0xc8] sm:$0xff] }
   0xd   :  { %4823 = vst [vmem:[#allocation7_spill] sm:$0xff] %v3182_v45  ;;  %4824 = vst [vmem:[#allocation8_spill] sm:$0xff] %v3195_v51  ;;  %v4661_v54 = vand.u32 4294901760, %v3152_v26  ;;  %v758_v57 = vand.u32 4294901760, %v757_v46  ;;  %v765_v58 = vand.u32 4294901760, %v764_v47  ;;  %v4660_v60 = vand.u32 4294901760, %v3156_v28 }
   0xe   :  { %4825 = vst [vmem:[#allocation9_spill] sm:$0xff] %v3197_v52  ;;  %v2714_v59 = vpack.c.bf16 %v653_v49, %v646_v48  ;;  %v771_v61 = vsub.f32 %v3140_v22, %v4662_v53  ;;  %v4657_v63 = vand.u32 4294901760, %v3158_v29  ;;  %v596_v0 = vand.u32 4294901760, %v487_v50  ;;  %v474_v41 = vld [vmem:[%s4644_s1 + $0x48] sm:$0xff] }
   0xf   :  { %v778_v62 = vsub.f32 %v3152_v26, %v4661_v54  ;;  %v2712_v2 = vpack.c.bf16 %v765_v58, %v758_v57  ;;  %2691 = vmatpush3.bf16.msra.mxu0 %v3182_v45  ;;  %v659_v3 = vsub.f32 %v3156_v28, %v4660_v60  ;;  %v599_v4 = vand.u32 4294901760, %v488_v55 }
  0x10   :  { %v548_v5 = vand.u32 4294901760, %v471_v56  ;;  %v772_v6 = vand.u32 4294901760, %v771_v61  ;;  %v666_v8 = vsub.f32 %v3158_v29, %v4657_v63  ;;  %v3225_v9 = vsub.f32 %v487_v50, %v596_v0 }
  0x11   :  { %v779_v7 = vand.u32 4294901760, %v778_v62  ;;  %2713 = vmatprep.subr.bf16.mxu1 %v2712_v2  ;;  %v660_v10 = vand.u32 4294901760, %v659_v3  ;;  %v3227_v11 = vpack.c.bf16 %v599_v4, %v596_v0  ;;  %v3229_v12 = vsub.f32 %v488_v55, %v599_v4  ;;  %v491_v4 = vld [vmem:[%s4644_s1 + $0xd0] sm:$0xff] }
  0x12   :  { %4826 = vst [vmem:[#allocation10_spill] sm:$0xff] %v3225_v9  ;;  %v551_v13 = vand.u32 4294901760, %v472_v1  ;;  %2715 = vmatpush3.bf16.msra.mxu1 %v2714_v59  ;;  %v667_v18 = vand.u32 4294901760, %v666_v8  ;;  %v3234_v23 = vsub.f32 %v471_v56, %v548_v5  ;;  %v4656_v24 = vand.u32 4294901760, %v3178_v43 }
  0x13   :  { %4827 = vst [vmem:[#allocation11_spill] sm:$0xff] %v3227_v11  ;;  %4828 = vst [vmem:[#allocation12_spill] sm:$0xff] %v3229_v12  ;;  %v2716_v17 = vpack.c.bf16 %v779_v7, %v772_v6  ;;  %2693 = vmatprep.subr.bf16.mxu0 %v3227_v11  ;;  %v4655_v37 = vand.u32 4294901760, %v3180_v44  ;;  %v4652_v40 = vand.u32 4294901760, %v3195_v51  ;;  %v4650_v48 = vand.u32 4294901760, %v3197_v52 }
  0x14   :  { %4829 = vst [vmem:[#allocation13_spill] sm:$0xff] %v3234_v23  ;;  %v3244_v35 = vpack.c.bf16 %v551_v13, %v548_v5  ;;  %v3246_v36 = vsub.f32 %v472_v1, %v551_v13  ;;  %v2718_v46 = vpack.c.bf16 %v667_v18, %v660_v10  ;;  %v785_v47 = vsub.f32 %v3178_v43, %v4656_v24  ;;  %v492_v5 = vld [vmem:[%s4644_s1 + $0xd8] sm:$0xff]  ;;  %v475_v13 = vld [vmem:[%s4644_s1 + $0x50] sm:$0xff] }
  0x15   :  { %2717 = vmatprep.subr.bf16.mxu1 %v2716_v17  ;;  %v602_v49 = vand.u32 4294901760, %v489_v16  ;;  %v792_v50 = vsub.f32 %v3180_v44, %v4655_v37  ;;  %v673_v55 = vsub.f32 %v3195_v51, %v4652_v40  ;;  %v605_v56 = vand.u32 4294901760, %v490_v25 }
  0x16   :  { %4830 = vst [vmem:[#allocation14_spill] sm:$0xff] %v3244_v35  ;;  %4831 = vst [vmem:[#allocation15_spill] sm:$0xff] %v3246_v36  ;;  %2695 = vmatpush3.bf16.msra.mxu0 %v3244_v35  ;;  %v554_v57 = vand.u32 4294901760, %v473_v34  ;;  %2719 = vmatpush3.bf16.msra.mxu1 %v2718_v46  ;;  %v786_v58 = vand.u32 4294901760, %v785_v47  ;;  %v680_v59 = vsub.f32 %v3197_v52, %v4650_v48  ;;  %v557_v62 = vand.u32 4294901760, %v474_v41 }
  0x17   :  { %v3267_v61 = vsub.f32 %v489_v16, %v602_v49  ;;  %v793_v0 = vand.u32 4294901760, %v792_v50  ;;  %v674_v1 = vand.u32 4294901760, %v673_v55  ;;  %v3269_v2 = vpack.c.bf16 %v605_v56, %v602_v49  ;;  %v476_v49 = vld [vmem:[%s4644_s1 + $0x58] sm:$0xff] }
  0x18   :  { %v3271_v3 = vsub.f32 %v490_v25, %v605_v56  ;;  %v681_v6 = vand.u32 4294901760, %v680_v59  ;;  %v3279_v7 = vpack.c.bf16 %v557_v62, %v554_v57  ;;  %v3281_v8 = vsub.f32 %v473_v34, %v554_v57 }
  0x19   :  { %4832 = vst [vmem:[#allocation16_spill] sm:$0xff] %v3269_v2  ;;  %v3283_v10 = vsub.f32 %v474_v41, %v557_v62  ;;  %v2720_v16 = vpack.c.bf16 %v793_v0, %v786_v58  ;;  %2697 = vmatprep.subr.bf16.mxu0 %v3269_v2  ;;  %v4648_v17 = vand.u32 4294901760, %v3225_v9  ;;  %v4647_v18 = vand.u32 4294901760, %v3229_v12 }
  0x1a   :  { %4833 = vst [vmem:[#allocation17_spill] sm:$0xff] %v3279_v7  ;;  %v4649_v25 = vand.u32 4294901760, %v3234_v23  ;;  %v2722_v46 = vpack.c.bf16 %v681_v6, %v674_v1  ;;  %2699 = vmatpush3.bf16.msra.mxu0 %v3279_v7  ;;  %v4651_v34 = vand.u32 4294901760, %v3246_v36  ;;  %v608_v41 = vand.u32 4294901760, %v491_v4 }
  0x1b   :  { %v611_v47 = vand.u32 4294901760, %v492_v5  ;;  %2721 = vmatprep.subr.bf16.mxu1 %v2720_v16  ;;  %v799_v50 = vsub.f32 %v3225_v9, %v4648_v17  ;;  %v806_v55 = vsub.f32 %v3229_v12, %v4647_v18  ;;  %v560_v57 = vand.u32 4294901760, %v475_v13 }
  0x1c   :  { %v687_v56 = vsub.f32 %v3234_v23, %v4649_v25  ;;  %2723 = vmatpush3.bf16.msra.mxu1 %v2722_v46  ;;  %v694_v58 = vsub.f32 %v3246_v36, %v4651_v34  ;;  %v3311_v62 = vsub.f32 %v491_v4, %v608_v41  ;;  %v563_v18 = vand.u32 4294901760, %v476_v49  ;;  %v493_v4 = vld [vmem:[%s4644_s1 + $0xe0] sm:$0xff] }
  0x1d   :  { %v3309_v59 = vpack.c.bf16 %v611_v47, %v608_v41  ;;  %v3313_v0 = vsub.f32 %v492_v5, %v611_v47  ;;  %v800_v1 = vand.u32 4294901760, %v799_v50  ;;  %v807_v6 = vand.u32 4294901760, %v806_v55  ;;  %v494_v5 = vld [vmem:[%s4644_s1 + $0xe8] sm:$0xff]  ;;  %v477_v41 = vld [vmem:[%s4644_s1 + $0x60] sm:$0xff] }
  0x1e   :  { %v688_v16 = vand.u32 4294901760, %v687_v56  ;;  %v695_v17 = vand.u32 4294901760, %v694_v58  ;;  %v3316_v25 = vsub.f32 %v475_v13, %v560_v57  ;;  %v4653_v46 = vand.u32 4294901760, %v3267_v61  ;;  %v478_v56 = vld [vmem:[%s4644_s1 + $0x68] sm:$0xff] }
  0x1f   :  { %4834 = vst [vmem:[#allocation18_spill] sm:$0xff] %v3309_v59  ;;  %2701 = vmatprep.subr.bf16.mxu0 %v3309_v59  ;;  %v4654_v48 = vand.u32 4294901760, %v3271_v3  ;;  %v2724_v47 = vpack.c.bf16 %v807_v6, %v800_v1  ;;  %v3329_v50 = vpack.c.bf16 %v563_v18, %v560_v57  ;;  %v3331_v13 = vsub.f32 %v476_v49, %v563_v18  ;;  %v3482_v59 = vld [vmem:[%s4645_s0 + $0xa0] sm:$0xff] }
  0x20   :  { %v4658_v55 = vand.u32 4294901760, %v3281_v8  ;;  %v2726_v58 = vpack.c.bf16 %v695_v17, %v688_v16  ;;  %v813_v34 = vsub.f32 %v3267_v61, %v4653_v46  ;;  %v4659_v57 = vand.u32 4294901760, %v3283_v10 }
  0x21   :  { %4835 = vst [vmem:[#allocation19_spill] sm:$0xff] %v3329_v50  ;;  %v820_v40 = vsub.f32 %v3271_v3, %v4654_v48  ;;  %2725 = vmatprep.subr.bf16.mxu1 %v2724_v47  ;;  %2703 = vmatpush3.bf16.msra.mxu0 %v3329_v50  ;;  %v614_v49 = vand.u32 4294901760, %v493_v4  ;;  %v617_v1 = vand.u32 4294901760, %v494_v5  ;;  %v566_v17 = vand.u32 4294901760, %v477_v41  ;;  %v3477_v50 = vld [vmem:[%s4645_s0 + $0x90] sm:$0xff] }
  0x22   :  { %v701_v18 = vsub.f32 %v3281_v8, %v4658_v55  ;;  %2727 = vmatpush3.bf16.msra.mxu1 %v2726_v58  ;;  %v814_v6 = vand.u32 4294901760, %v813_v34  ;;  %v708_v46 = vsub.f32 %v3283_v10, %v4659_v57  ;;  %v569_v48 = vand.u32 4294901760, %v478_v56  ;;  %v495_v55 = vld [vmem:[%s4644_s1 + $0xf0] sm:$0xff] }
  0x23   :  { %v821_v16 = vand.u32 4294901760, %v820_v40  ;;  %v3351_v47 = vpack.c.bf16 %v617_v1, %v614_v49  ;;  %v3353_v24 = vsub.f32 %v493_v4, %v614_v49  ;;  %v3355_v63 = vsub.f32 %v494_v5, %v617_v1  ;;  %v496_v40 = vld [vmem:[%s4644_s1 + $0xf8] sm:$0xff]  ;;  %v479_v4 = vld [vmem:[%s4644_s1 + $0x70] sm:$0xff] }
  0x24   :  { %v702_v37 = vand.u32 4294901760, %v701_v18  ;;  %v709_v58 = vand.u32 4294901760, %v708_v46  ;;  %v3363_v57 = vpack.c.bf16 %v569_v48, %v566_v17  ;;  %v3365_v60 = vsub.f32 %v477_v41, %v566_v17 }
  0x25   :  { %4836 = vst [vmem:[#allocation20_spill] sm:$0xff] %v3351_v47  ;;  %v2728_v34 = vpack.c.bf16 %v821_v16, %v814_v6  ;;  %2705 = vmatprep.subr.bf16.mxu0 %v3351_v47  ;;  %v3371_v5 = vsub.f32 %v478_v56, %v569_v48  ;;  %v4664_v18 = vand.u32 4294901760, %v3311_v62  ;;  %v4667_v49 = vand.u32 4294901760, %v3313_v0  ;;  %v480_v16 = vld [vmem:[%s4644_s1 + $0x78] sm:$0xff] }
  0x26   :  { %4837 = vst [vmem:[#allocation21_spill] sm:$0xff] %v3363_v57  ;;  %4838 = vst [vmem:[#allocation22_spill] sm:$0xff] %v3365_v60  ;;  %v4669_v1 = vand.u32 4294901760, %v3316_v25  ;;  %v2730_v46 = vpack.c.bf16 %v709_v58, %v702_v37  ;;  %2707 = vmatpush3.bf16.msra.mxu0 %v3363_v57  ;;  %v4675_v41 = vand.u32 4294901760, %v3331_v13  ;;  %v620_v17 = vand.u32 4294901760, %v495_v55 }
  0x27   :  { %4839 = vst [vmem:[#allocation23_spill] sm:$0xff] %v3371_v5  ;;  %2729 = vmatprep.subr.bf16.mxu1 %v2728_v34  ;;  %v623_v6 = vand.u32 4294901760, %v496_v40  ;;  %v827_v48 = vsub.f32 %v3311_v62, %v4664_v18  ;;  %v834_v56 = vsub.f32 %v3313_v0, %v4667_v49  ;;  %v572_v34 = vand.u32 4294901760, %v479_v4 }
  0x28   :  { %v715_v37 = vsub.f32 %v3316_v25, %v4669_v1  ;;  %2731 = vmatpush3.bf16.msra.mxu1 %v2730_v46  ;;  %v722_v58 = vsub.f32 %v3331_v13, %v4675_v41  ;;  %v3395_v53 = vsub.f32 %v495_v55, %v620_v17  ;;  %v575_v49 = vand.u32 4294901760, %v480_v16  ;;  %v3407_v55 = vld [vmem:[%s4645_s0] sm:$0xff] }
  0x29   :  { %v3393_v54 = vpack.c.bf16 %v623_v6, %v620_v17  ;;  %v3397_v33 = vsub.f32 %v496_v40, %v623_v6  ;;  %v828_v18 = vand.u32 4294901760, %v827_v48  ;;  %v835_v32 = vand.u32 4294901760, %v834_v56  ;;  %v3412_v40 = vld [vmem:[%s4645_s0 + $0x10] sm:$0xff]  ;;  %v3422_v56 = vld [vmem:[%s4645_s0 + $0x20] sm:$0xff] }
  0x2a   :  { %v716_v39 = vand.u32 4294901760, %v715_v37  ;;  %v723_v38 = vand.u32 4294901760, %v722_v58  ;;  %v3400_v1 = vsub.f32 %v479_v4, %v572_v34  ;;  %v4673_v46 = vand.u32 4294901760, %v3353_v24 }
  0x2b   :  { %4840 = vst [vmem:[#allocation24_spill] sm:$0xff] %v3393_v54  ;;  %2709 = vmatprep.subr.bf16.mxu0 %v3393_v54  ;;  %v4672_v57 = vand.u32 4294901760, %v3355_v63  ;;  %v2732_v17 = vpack.c.bf16 %v835_v32, %v828_v18  ;;  %v3414_v6 = vpack.c.bf16 %v575_v49, %v572_v34  ;;  %v3416_v48 = vsub.f32 %v480_v16, %v575_v49  ;;  %v3434_v49 = vld [vmem:[%s4645_s0 + $0x30] sm:$0xff]  ;;  %v3439_v16 = vld [vmem:[%s4645_s0 + $0x40] sm:$0xff] }
  0x2c   :  { %v4674_v4 = vand.u32 4294901760, %v3365_v60  ;;  %v2734_v37 = vpack.c.bf16 %v723_v38, %v716_v39  ;;  %v841_v58 = vsub.f32 %v3353_v24, %v4673_v46  ;;  %v3444_v38 = vld [vmem:[%s4645_s0 + $0x50] sm:$0xff]  ;;  %v3453_v34 = vld [vmem:[%s4645_s0 + $0x60] sm:$0xff]  ;;  %v59_v46 = vcombine.high %v3407_v55, %v3407_v55 }
  0x2d   :  { %4841 = vst [vmem:[#allocation25_spill] sm:$0xff] %v3414_v6  ;;  %v848_v32 = vsub.f32 %v3355_v63, %v4672_v57  ;;  %2733 = vmatprep.subr.bf16.mxu1 %v2732_v17  ;;  %2711 = vmatpush3.bf16.msra.mxu0 %v3414_v6  ;;  %v3458_v57 = vld [vmem:[%s4645_s0 + $0x70] sm:$0xff]  ;;  %v3463_v17 = vld [vmem:[%s4645_s0 + $0x80] sm:$0xff]  ;;  %v108_v41 = vsel %vm107_vm0, %v3407_v55, 0.0  ;;  %v4842_v54 = vand.u32 4294901760, %v3371_v5  ;;  %v67_v7 = vcombine.high %v3439_v16, %v3439_v16 }
  0x2e   :  { %v729_v39 = vsub.f32 %v3365_v60, %v4674_v4  ;;  %v61_v4 = vcombine.high %v3412_v40, %v3412_v40  ;;  %2735 = vmatpush3.bf16.msra.mxu1 %v2734_v37  ;;  %v842_v18 = vand.u32 4294901760, %v841_v58  ;;  %v3487_v37 = vld [vmem:[%s4645_s0 + $0xb0] sm:$0xff]  ;;  %v63_v58 = vcombine.high %v3422_v56, %v3422_v56 }
  0x2f   :  { %v849_v6 = vand.u32 4294901760, %v848_v32  ;;  %v736_v47 = vsub.f32 %v3371_v5, %v4842_v54  ;;  %v65_v54 = vcombine.high %v3434_v49, %v3434_v49  ;;  %v69_v2 = vcombine.high %v3444_v38, %v3444_v38 }
  0x30   :  { %v730_v32 = vand.u32 4294901760, %v729_v39  ;;  %v71_v45 = vcombine.high %v3453_v34, %v3453_v34  ;;  %v73_v42 = vcombine.high %v3458_v57, %v3458_v57  ;;  %v75_v39 = vcombine.high %v3463_v17, %v3463_v17 }
  0x31   :  { %v2736_v35 = vpack.c.bf16 %v849_v6, %v842_v18  ;;  %v737_v11 = vand.u32 4294901760, %v736_v47  ;;  %v77_v27 = vcombine.high %v3477_v50, %v3477_v50  ;;  %v79_v21 = vcombine.high %v3482_v59, %v3482_v59 }
  0x32   :  { %v81_v19 = vcombine.high %v3487_v37, %v3487_v37  ;;  %v109_v6 = vsel %vm107_vm0, %v3439_v16, 0.0  ;;  %v111_v18 = vsel %vm107_vm0, %v3463_v17, 0.0  ;;  %v113_v14 = vsel %vm107_vm0, %v59_v46, 0.0 }
  0x33   :  { %2737 = vmatprep.subr.bf16.mxu1 %v2736_v35  ;;  %v2738_v47 = vpack.c.bf16 %v737_v11, %v730_v32  ;;  %v110_v36 = vadd.f32 %v109_v6, %v108_v41  ;;  %v114_v23 = vsel %vm107_vm0, %v67_v7, 0.0  ;;  %v116_v12 = vsel %vm107_vm0, %v75_v39, 0.0 }
  0x34   :  { %v128_v9 = vsel %vm107_vm0, %v3412_v40, 0.0  ;;  %v115_v5 = vadd.f32 %v114_v23, %v113_v14  ;;  %v129_v11 = vsel %vm107_vm0, %v3444_v38, 0.0  ;;  %v131_v35 = vsel %vm107_vm0, %v3477_v50, 0.0 }
  0x35   :  { %2739 = vmatpush3.bf16.msra.mxu1 %v2738_v47  ;;  %v133_v32 = vsel %vm107_vm0, %v61_v4, 0.0  ;;  %v112_v60 = vadd.f32 %v111_v18, %v110_v36  ;;  %v130_v46 = vadd.f32 %v129_v11, %v128_v9  ;;  %v134_v41 = vsel %vm107_vm0, %v69_v2, 0.0 }
  0x36   :  { %v136_v7 = vsel %vm107_vm0, %v77_v27, 0.0  ;;  %v117_v39 = vadd.f32 %v116_v12, %v115_v5  ;;  %v135_v6 = vadd.f32 %v134_v41, %v133_v32  ;;  %v148_v47 = vsel %vm107_vm0, %v3422_v56, 0.0 }
  0x37   :  { %v149_v14 = vsel %vm107_vm0, %v3453_v34, 0.0  ;;  %v132_v23 = vadd.f32 %v131_v35, %v130_v46  ;;  %v151_v51 = vsel %vm107_vm0, %v3482_v59, 0.0  ;;  %v153_v36 = vsel %vm107_vm0, %v63_v58, 0.0 }
  0x38   :  { %v150_v52 = vadd.f32 %v149_v14, %v148_v47  ;;  %v137_v9 = vadd.f32 %v136_v7, %v135_v6  ;;  %v154_v2 = vsel %vm107_vm0, %v71_v45, 0.0  ;;  %v156_v27 = vsel %vm107_vm0, %v79_v21, 0.0 }
  0x39   :  { %v168_v12 = vsel %vm107_vm0, %v3434_v49, 0.0  ;;  %v155_v4 = vadd.f32 %v154_v2, %v153_v36  ;;  %v169_v18 = vsel %vm107_vm0, %v3458_v57, 0.0  ;;  %v171_v11 = vsel %vm107_vm0, %v3487_v37, 0.0 }
  0x3a   :  { %v152_v5 = vadd.f32 %v151_v51, %v150_v52  ;;  %v170_v35 = vadd.f32 %v169_v18, %v168_v12  ;;  %v173_v32 = vsel %vm107_vm0, %v65_v54, 0.0  ;;  %v174_v58 = vsel %vm107_vm0, %v73_v42, 0.0 }
  0x3b   :  { %v176_v45 = vsel %vm107_vm0, %v81_v19, 0.0  ;;  %v157_v46 = vadd.f32 %v156_v27, %v155_v4  ;;  %v175_v21 = vadd.f32 %v174_v58, %v173_v32  ;;  %v189_v41 = vmul.f32 0.33333334, %v112_v60 }
  0x3c   :  { %v190_v7 = vmul.f32 0.33333334, %v117_v39  ;;  %v172_v6 = vadd.f32 %v171_v11, %v170_v35  ;;  %v193_v51 = vmul.f32 0.33333334, %v132_v23  ;;  %v194_v52 = vmul.f32 0.33333334, %v137_v9 }
  0x3d   :  { %v197_v47 = vmul.f32 0.33333334, %v152_v5  ;;  %v177_v14 = vadd.f32 %v176_v45, %v175_v21  ;;  %v198_v36 = vmul.f32 0.33333334, %v157_v46  ;;  %v2744_v12 = vpack.c.bf16 %v3163_v31, %v3161_v30 }
  0x3e   :  { %v221_v2 = vcombine.low %v189_v41, %v190_v7  ;;  %v201_v18 = vmul.f32 0.33333334, %v172_v6  ;;  %v223_v54 = vcombine.low %v193_v51, %v194_v52  ;;  %v854_v42 = vand.u32 4294901760, %v3395_v53 }
  0x3f   :  { %v861_v19 = vand.u32 4294901760, %v3397_v33  ;;  %v202_v27 = vmul.f32 0.33333334, %v177_v14  ;;  %v225_v4 = vcombine.low %v197_v47, %v198_v36  ;;  %2745 = vmatprep.subr.bf16.mxu0 %v2744_v12 }
  0x40   :  { %v237_v60 = vsub.f32 %v3407_v55, %v221_v2  ;;  %v245_v39 = vsub.f32 %v3439_v16, %v221_v2  ;;  %v239_v23 = vsub.f32 %v3412_v40, %v223_v54  ;;  %v247_v9 = vsub.f32 %v3444_v38, %v223_v54 }
  0x41   :  { %v253_v5 = vsub.f32 %v3463_v17, %v221_v2  ;;  %v255_v11 = vsub.f32 %v3477_v50, %v223_v54  ;;  %v227_v35 = vcombine.low %v201_v18, %v202_v27  ;;  %v241_v32 = vsub.f32 %v3422_v56, %v225_v4 }
  0x42   :  { %v249_v58 = vsub.f32 %v3453_v34, %v225_v4  ;;  %v257_v45 = vsub.f32 %v3482_v59, %v225_v4  ;;  %v261_v46 = vmul.f32 %v237_v60, %v237_v60  ;;  %v263_v55 = vmul.f32 %v239_v23, %v239_v23 }
  0x43   :  { %v269_v21 = vmul.f32 %v245_v39, %v245_v39  ;;  %v271_v16 = vmul.f32 %v247_v9, %v247_v9  ;;  %v243_v41 = vsub.f32 %v3434_v49, %v227_v35  ;;  %v251_v40 = vsub.f32 %v3458_v57, %v227_v35 }
  0x44   :  { %v259_v38 = vsub.f32 %v3487_v37, %v227_v35  ;;  %v265_v17 = vmul.f32 %v241_v32, %v241_v32  ;;  %v273_v7 = vmul.f32 %v249_v58, %v249_v58  ;;  %v277_v50 = vmul.f32 %v253_v5, %v253_v5 }
  0x45   :  { %v279_v6 = vmul.f32 %v255_v11, %v255_v11  ;;  %v281_v51 = vmul.f32 %v257_v45, %v257_v45  ;;  %v267_v56 = vmul.f32 %v243_v41, %v243_v41  ;;  %v275_v52 = vmul.f32 %v251_v40, %v251_v40 }
  0x46   :  { %v283_v34 = vmul.f32 %v259_v38, %v259_v38  ;;  %v309_v47 = vcombine.high %v261_v46, %v261_v46  ;;  %v311_v59 = vcombine.high %v263_v55, %v263_v55  ;;  %v313_v14 = vcombine.high %v265_v17, %v265_v17 }
  0x47   :  { %v317_v36 = vcombine.high %v269_v21, %v269_v21  ;;  %v319_v2 = vcombine.high %v271_v16, %v271_v16  ;;  %v315_v12 = vcombine.high %v267_v56, %v267_v56  ;;  %v321_v18 = vcombine.high %v273_v7, %v273_v7 }
  0x48   :  { %v323_v49 = vcombine.high %v275_v52, %v275_v52  ;;  %v325_v54 = vcombine.high %v277_v50, %v277_v50  ;;  %v327_v57 = vcombine.high %v279_v6, %v279_v6  ;;  %v329_v27 = vcombine.high %v281_v51, %v281_v51 }
  0x49   :  { %v331_v37 = vcombine.high %v283_v34, %v283_v34  ;;  %v362_v4 = vsel %vm107_vm0, %v309_v47, 0.0  ;;  %v363_v60 = vsel %vm107_vm0, %v317_v36, 0.0  ;;  %v382_v23 = vsel %vm107_vm0, %v311_v59, 0.0 }
  0x4a   :  { %v365_v39 = vsel %vm107_vm0, %v325_v54, 0.0  ;;  %v383_v9 = vsel %vm107_vm0, %v319_v2, 0.0  ;;  %v364_v5 = vadd.f32 %v363_v60, %v362_v4  ;;  %v385_v35 = vsel %vm107_vm0, %v327_v57, 0.0 }
  0x4b   :  { %v384_v11 = vadd.f32 %v383_v9, %v382_v23  ;;  %v402_v32 = vsel %vm107_vm0, %v313_v14, 0.0  ;;  %v403_v58 = vsel %vm107_vm0, %v321_v18, 0.0  ;;  %v405_v45 = vsel %vm107_vm0, %v329_v27, 0.0 }
  0x4c   :  { %v422_v41 = vsel %vm107_vm0, %v315_v12, 0.0  ;;  %v423_v40 = vsel %vm107_vm0, %v323_v49, 0.0  ;;  %v366_v38 = vadd.f32 %v365_v39, %v364_v5  ;;  %v404_v36 = vadd.f32 %v403_v58, %v402_v32 }
  0x4d   :  { %v386_v47 = vadd.f32 %v385_v35, %v384_v11  ;;  %v424_v59 = vadd.f32 %v423_v40, %v422_v41  ;;  %v425_v2 = vsel %vm107_vm0, %v331_v37, 0.0  ;;  %v357_v54 = vsel %vm107_vm0, %v261_v46, 0.0 }
  0x4e   :  { %v358_v57 = vsel %vm107_vm0, %v269_v21, 0.0  ;;  %v360_v14 = vsel %vm107_vm0, %v277_v50, 0.0  ;;  %v406_v4 = vadd.f32 %v405_v45, %v404_v36  ;;  %v444_v27 = vsel %vm107_vm0, %v366_v38, 0.0 }
  0x4f   :  { %v426_v18 = vadd.f32 %v425_v2, %v424_v59  ;;  %v445_v12 = vsel %vm107_vm0, %v386_v47, 0.0  ;;  %v359_v49 = vadd.f32 %v358_v57, %v357_v54  ;;  %v377_v39 = vsel %vm107_vm0, %v263_v55, 0.0 }
  0x50   :  { %v446_v60 = vadd.f32 %v445_v12, %v444_v27  ;;  %v378_v23 = vsel %vm107_vm0, %v271_v16, 0.0  ;;  %v447_v37 = vsel %vm107_vm0, %v406_v4, 0.0  ;;  %v380_v21 = vsel %vm107_vm0, %v279_v6, 0.0 }
  0x51   :  { %v449_v46 = vsel %vm107_vm0, %v426_v18, 0.0  ;;  %v379_v9 = vadd.f32 %v378_v23, %v377_v39  ;;  %v361_v5 = vadd.f32 %v360_v14, %v359_v49  ;;  %v397_v11 = vsel %vm107_vm0, %v265_v17, 0.0 }
  0x52   :  { %v448_v50 = vadd.f32 %v447_v37, %v446_v60  ;;  %v398_v35 = vsel %vm107_vm0, %v273_v7, 0.0  ;;  %v400_v45 = vsel %vm107_vm0, %v281_v51, 0.0  ;;  %v417_v55 = vsel %vm107_vm0, %v267_v56, 0.0 }
  0x53   :  { %v381_v32 = vadd.f32 %v380_v21, %v379_v9  ;;  %v399_v58 = vadd.f32 %v398_v35, %v397_v11  ;;  %v418_v41 = vsel %vm107_vm0, %v275_v52, 0.0  ;;  %v420_v40 = vsel %vm107_vm0, %v283_v34, 0.0 }
  0x54   :  { %v450_v16 = vadd.f32 %v449_v46, %v448_v50  ;;  %v437_v38 = vsel %vm107_vm0, %v361_v5, 0.0  ;;  %v419_v47 = vadd.f32 %v418_v41, %v417_v55  ;;  %v855_v17 = vsub.f32 %v3395_v53, %v854_v42 }
  0x55   :  { %v401_v6 = vadd.f32 %v400_v45, %v399_v58  ;;  %v438_v36 = vsel %vm107_vm0, %v381_v32, 0.0  ;;  %v862_v56 = vsub.f32 %v3397_v33, %v861_v19  ;;  %v742_v2 = vand.u32 4294901760, %v3400_v1 }
  0x56   :  { %v3592_v7 = vand.u32 4294901760, %v450_v16  ;;  %v439_v51 = vadd.f32 %v438_v36, %v437_v38  ;;  %v421_v52 = vadd.f32 %v420_v40, %v419_v47  ;;  %v856_v59 = vand.u32 4294901760, %v855_v17  ;;  %v4844_v38 = vld [vmem:[#allocation8_spill] sm:$0xff]  ;;  %v4846_v36 = vld [vmem:[#allocation22_spill] sm:$0xff]  ;;  %v4847_v17 = vld [vmem:[#allocation23_spill] sm:$0xff] }
  0x57   :  { %v440_v34 = vsel %vm107_vm0, %v401_v6, 0.0  ;;  %v863_v14 = vand.u32 4294901760, %v862_v56  ;;  %v749_v4 = vand.u32 4294901760, %v3416_v48  ;;  %v743_v27 = vsub.f32 %v3400_v1, %v742_v2  ;;  %v4845_v6 = vld [vmem:[#allocation9_spill] sm:$0xff]  ;;  %v4878_v40 = vld [vmem:[#allocation3_spill] sm:$0xff] }
  0x58   :  { %v3600_v54 = vsub.f32 %v450_v16, %v3592_v7  ;;  %v441_v57 = vadd.f32 %v440_v34, %v439_v51  ;;  %866 = vmatprep.mubr.f32.mxu1 %v3592_v7  ;;  %v442_v18 = vsel %vm107_vm0, %v421_v52, 0.0  ;;  %v2746_v23 = vpack.c.bf16 %v3136_v20, %v3129_v15  ;;  %v4848_v52 = vld [vmem:[#allocation10_spill] sm:$0xff]  ;;  %v4849_v34 = vld [vmem:[#allocation12_spill] sm:$0xff] }
  0x59   :  { %v2740_v49 = vpack.c.bf16 %v863_v14, %v856_v59  ;;  %v750_v39 = vsub.f32 %v3416_v48, %v749_v4  ;;  %v744_v37 = vand.u32 4294901760, %v743_v27  ;;  %v4851_v14 = vld [vmem:[#allocation15_spill] sm:$0xff]  ;;  %v4857_v51 = vand.u32 4294901760, %v3140_v22 }
  0x5a   :  { %v627_v12 = vand.u32 4294901760, %v3600_v54  ;;  %v443_v60 = vadd.f32 %v442_v18, %v441_v57  ;;  %v4850_v57 = vld [vmem:[#allocation13_spill] sm:$0xff]  ;;  %v4858_v27 = vand.u32 4294901760, %v3152_v26  ;;  %v4872_v35 = vand.u32 4294901760, %v3355_v63 }
  0x5b   :  { %2741 = vmatprep.subr.bf16.mxu1 %v2740_v49  ;;  %v751_v21 = vand.u32 4294901760, %v750_v39  ;;  %v4853_v39 = vand.u32 4294901760, %v3161_v30  ;;  %v513_v30 = vld [vmem:[%s4644_s1 + $0x180] sm:$0xff]  ;;  %v4866_v49 = vand.u32 4294901760, %v3313_v0  ;;  %v4874_v5 = vand.u32 4294901760, %v4846_v36 }
  0x5c   :  { %v628_v46 = vsub.f32 %v3600_v54, %v627_v12  ;;  %v3611_v9 = vand.u32 4294901760, %v443_v60  ;;  %v3662_v16 = vpack.c.bf16 %v4858_v27, %v4857_v51  ;;  %v4862_v51 = vand.u32 4294901760, %v3281_v8 }
  0x5d   :  { %v2742_v55 = vpack.c.bf16 %v751_v21, %v744_v37  ;;  %v4854_v37 = vand.u32 4294901760, %v3163_v31  ;;  %v4855_v21 = vand.u32 4294901760, %v3129_v15  ;;  %v514_v31 = vld [vmem:[%s4644_s1 + $0x188] sm:$0xff]  ;;  %v4863_v27 = vand.u32 4294901760, %v3283_v10 }
  0x5e   :  { %4843 = vst [vmem:[#allocation26_spill] sm:$0xff] %v3611_v9  ;;  %v629_v58 = vand.u32 4294901760, %v628_v46  ;;  %v3624_v45 = vsub.f32 %v443_v60, %v3611_v9  ;;  %v4852_v60 = vld [vmem:[#allocation2_spill] sm:$0xff]  ;;  %v4875_v18 = vand.u32 4294901760, %v4847_v17  ;;  %v3725_v47 = vpack.c.bf16 %v861_v19, %v854_v42  ;;  %v500_v42 = vld [vmem:[%s4644_s1 + $0x118] sm:$0xff]  ;;  %v4880_v19 = vld [vmem:[#allocation4_spill] sm:$0xff] }
  0x5f   :  { %2743 = vmatpush3.bf16.msra.mxu1 %v2742_v55  ;;  %v3650_v46 = vpack.c.bf16 %v4854_v37, %v4853_v39  ;;  %v4860_v39 = vand.u32 4294901760, %v3158_v29  ;;  %v1443_v41 = vand.u32 4294901760, %v514_v31 }
  0x60   :  { %630 = vmatprep.mubr.f32.mxu0 %v629_v58  ;;  %v4722_v56 = vand.u32 4294901760, %v3624_v45  ;;  %2777 = vmatprep.subr.bf16.mxu1 %v4852_v60  ;;  %v4856_v58 = vand.u32 4294901760, %v3136_v20  ;;  %v4859_v20 = vand.u32 4294901760, %v3156_v28  ;;  %v3719_v59 = vpack.c.bf16 %v4875_v18, %v4874_v5  ;;  %4877 = vst [vmem:[#allocation13_spill] sm:$0xff] %v3725_v47  ;;  %v499_v5 = vld [vmem:[%s4644_s1 + $0x110] sm:$0xff] }
  0x61   :  { %v4881_v18 = vand.u32 4294901760, %v3178_v43 }
  0x62   :  { %v3656_v55 = vpack.c.bf16 %v4856_v58, %v4855_v21  ;;  %v634_v15 = vsub.f32 %v3624_v45, %v4722_v56  ;;  %v3677_v37 = vpack.c.bf16 %v4860_v39, %v4859_v20  ;;  %v3683_v21 = vpack.c.bf16 %v4863_v27, %v4862_v51  ;;  %v497_v56 = vld [vmem:[%s4644_s1 + $0x100] sm:$0xff]  ;;  %v498_v20 = vld [vmem:[%s4644_s1 + $0x108] sm:$0xff]  ;;  %v3700_v39 = vld [vmem:[%s4644_s1 + $0x190] sm:$0xff]  ;;  %868 = vmatmul.mubr.f32.vlgmr.msra.gmra.mrb[0].mxu1 %v3611_v9 }
  0x63   :  { %v4865_v58 = vand.u32 4294901760, %v3311_v62  ;;  %v4868_v51 = vand.u32 4294901760, %v3316_v25  ;;  %4876 = vst [vmem:[#allocation12_spill] sm:$0xff] %v3719_v59  ;;  %2779 = vmatpush3.bf16.msra.mxu1 %v4878_v40  ;;  %1110 = vmatprep.mubr.f32.mxu1 %v627_v12  ;;  %v1446_v12 = vand.u32 4294901760, %v3700_v39  ;;  %v4884_v9 = vand.u32 4294901760, %v4844_v38 }
  0x64   :  { %4861 = vst [vmem:[#allocation8_spill] sm:$0xff] %v3677_v37  ;;  %4864 = vst [vmem:[#allocation9_spill] sm:$0xff] %v3683_v21  ;;  %2781 = vmatprep.subr.bf16.mxu1 %v4880_v19  ;;  %v517_v21 = vld [vmem:[%s4644_s1 + $0x1a0] sm:$0xff] }
  0x65   :  { %v3689_v32 = vpack.c.bf16 %v4866_v49, %v4865_v58  ;;  %v4869_v49 = vand.u32 4294901760, %v3331_v13  ;;  %v4871_v58 = vand.u32 4294901760, %v3353_v24 }
  0x67   :  { %4867 = vst [vmem:[#allocation22_spill] sm:$0xff] %v3689_v32  ;;  %v3707_v27 = vpack.c.bf16 %v4869_v49, %v4868_v51  ;;  %v3713_v11 = vpack.c.bf16 %v4872_v35, %v4871_v58  ;;  %v516_v51 = vld [vmem:[%s4644_s1 + $0x198] sm:$0xff]  ;;  %v635_v49 = vand.u32 4294901760, %v634_v15  ;;  %v3731_v35 = vpack.c.bf16 %v749_v4, %v742_v2 }
  0x68   :  { %v1440_v58 = vand.u32 4294901760, %v513_v30  ;;  %v4882_v15 = vand.u32 4294901760, %v3180_v44  ;;  %v1392_v2 = vand.u32 4294901760, %v497_v56  ;;  %v1395_v4 = vand.u32 4294901760, %v498_v20 }
  0x69   :  { %4870 = vst [vmem:[#allocation23_spill] sm:$0xff] %v3707_v27  ;;  %4873 = vst [vmem:[#allocation10_spill] sm:$0xff] %v3713_v11  ;;  %636 = vmatmul.mubr.f32.vlgmr.msra.gmra.mrb[0].mxu0 %v635_v49  ;;  %v3755_v11 = vsub.f32 %v514_v31, %v1443_v41  ;;  %v1449_v27 = vand.u32 4294901760, %v516_v51  ;;  %v1398_v32 = vand.u32 4294901760, %v499_v5  ;;  %v1401_v49 = vand.u32 4294901760, %v500_v42 }
  0x6a   :  { %4879 = vst [vmem:[#allocation15_spill] sm:$0xff] %v3731_v35  ;;  %v3744_v50 = vpack.c.bf16 %v4882_v15, %v4881_v18  ;;  %v4885_v35 = vand.u32 4294901760, %v4845_v6  ;;  %v3753_v59 = vsub.f32 %v513_v30, %v1440_v58  ;;  %2747 = vmatpush3.bf16.msra.mxu0 %v2746_v23  ;;  %1003 = vmatprep.mubr.f32.mxu0 %v3600_v54  ;;  %v4892_v30 = vld [vmem:[#allocation5_spill] sm:$0xff]  ;;  %v4893_v23 = vand.u32 4294901760, %v4848_v52 }
  0x6b   :  { %4888 = vst [vmem:[#allocation27_spill] sm:$0xff] %v3755_v11  ;;  %v3758_v18 = vsub.f32 %v497_v56, %v1392_v2  ;;  %v3760_v15 = vsub.f32 %v498_v20, %v1395_v4  ;;  %2783 = vmatpush3.bf16.msra.mxu1 %v4892_v30  ;;  %v4894_v54 = vand.u32 4294901760, %v4849_v34  ;;  %v4896_v31 = vand.u32 4294901760, %v4850_v57 }
  0x6c   :  { %4883 = vst [vmem:[#allocation2_spill] sm:$0xff] %v3744_v50  ;;  %v3751_v47 = vpack.c.bf16 %v4885_v35, %v4884_v9  ;;  %4887 = vst [vmem:[#allocation4_spill] sm:$0xff] %v3753_v59  ;;  %v4891_v9 = vpack.c.bf16 %v3152_v26, %v3140_v22  ;;  %v4897_v20 = vand.u32 4294901760, %v4851_v14  ;;  %v4900_v50 = vand.u32 4294901760, %v3271_v3 }
  0x6d   :  { %4889 = vst [vmem:[#allocation28_spill] sm:$0xff] %v3758_v18  ;;  %4890 = vst [vmem:[#allocation29_spill] sm:$0xff] %v3760_v15  ;;  %v3773_v56 = vpack.c.bf16 %v4894_v54, %v4893_v23  ;;  %v4727_v26 = vand.u32 4294901760, %v3753_v59  ;;  %v3789_v37 = vpack.c.bf16 %v1443_v41, %v1440_v58  ;;  %v3791_v23 = vpack.c.bf16 %v1395_v4, %v1392_v2  ;;  %v502_v2 = vld [vmem:[%s4644_s1 + $0x128] sm:$0xff] }
  0x6e   :  { %4886 = vst [vmem:[#allocation3_spill] sm:$0xff] %v3751_v47  ;;  %2749 = vmatprep.subr.bf16.mxu0 %v4891_v9  ;;  %v3779_v35 = vpack.c.bf16 %v4897_v20, %v4896_v31  ;;  %v4899_v47 = vand.u32 4294901760, %v3267_v61  ;;  %v4902_v9 = vld [vmem:[#allocation6_spill] sm:$0xff]  ;;  %v3794_v54 = vsub.f32 %v3700_v39, %v1446_v12  ;;  %v518_v20 = vld [vmem:[%s4644_s1 + $0x1a8] sm:$0xff]  ;;  %v1452_v39 = vand.u32 4294901760, %v517_v21 }
  0x6f   :  { %4895 = vst [vmem:[#allocation5_spill] sm:$0xff] %v3773_v56  ;;  %2785 = vmatprep.subr.bf16.mxu1 %v4902_v9  ;;  %4903 = vst [vmem:[#allocation6_spill] sm:$0xff] %v3789_v37  ;;  %v1619_v41 = vsub.f32 %v3753_v59, %v4727_v26  ;;  %v4906_v4 = vpack.c.bf16 %v3158_v29, %v3156_v28  ;;  %v3814_v31 = vsub.f32 %v516_v51, %v1449_v27  ;;  %v4912_v59 = vld [vmem:[#allocation7_spill] sm:$0xff] }
  0x70   :  { %4898 = vst [vmem:[#allocation30_spill] sm:$0xff] %v3779_v35  ;;  %v3785_v22 = vpack.c.bf16 %v4900_v50, %v4899_v47  ;;  %4904 = vst [vmem:[#allocation32_spill] sm:$0xff] %v3791_v23  ;;  %v501_v50 = vld [vmem:[%s4644_s1 + $0x120] sm:$0xff]  ;;  %v3816_v23 = vsub.f32 %v499_v5, %v1398_v32  ;;  %v3818_v37 = vsub.f32 %v500_v42, %v1401_v49  ;;  %v4910_v26 = vand.u32 4294901760, %v3755_v11 }
  0x71   :  { %4905 = vst [vmem:[#allocation33_spill] sm:$0xff] %v3794_v54  ;;  %2751 = vmatpush3.bf16.msra.mxu0 %v4906_v4  ;;  %4907 = vst [vmem:[#allocation34_spill] sm:$0xff] %v3814_v31  ;;  %v4911_v58 = vpack.c.bf16 %v3180_v44, %v3178_v43  ;;  %2787 = vmatpush3.bf16.msra.mxu1 %v4912_v59  ;;  %v4914_v29 = vand.u32 4294901760, %v3760_v15  ;;  %v1455_v5 = vand.u32 4294901760, %v518_v20  ;;  %v1404_v42 = vand.u32 4294901760, %v501_v50  ;;  %v4915_v4 = vld [vmem:[#allocation11_spill] sm:$0xff] }
  0x72   :  { %4901 = vst [vmem:[#allocation31_spill] sm:$0xff] %v3785_v22  ;;  %4908 = vst [vmem:[#allocation35_spill] sm:$0xff] %v3816_v23  ;;  %v1626_v47 = vsub.f32 %v3755_v11, %v4910_v26  ;;  %v4913_v22 = vand.u32 4294901760, %v3758_v18  ;;  %2789 = vmatprep.subr.bf16.mxu1 %v4915_v4  ;;  %v3834_v35 = vpack.c.bf16 %v1449_v27, %v1446_v12  ;;  %v1620_v43 = vand.u32 4294901760, %v1619_v41 }
  0x73   :  { %4909 = vst [vmem:[#allocation36_spill] sm:$0xff] %v3818_v37  ;;  %2753 = vmatprep.subr.bf16.mxu0 %v4911_v58  ;;  %v1514_v51 = vsub.f32 %v3760_v15, %v4914_v29  ;;  %v3836_v26 = vpack.c.bf16 %v1401_v49, %v1398_v32  ;;  %v1407_v44 = vand.u32 4294901760, %v502_v2  ;;  %v3838_v56 = vpack.c.bf16 %v1455_v5, %v1452_v39 }
  0x74   :  { %v1507_v28 = vsub.f32 %v3758_v18, %v4913_v22  ;;  %v1627_v58 = vand.u32 4294901760, %v1626_v47  ;;  %v3840_v59 = vsub.f32 %v517_v21, %v1452_v39  ;;  %v519_v22 = vld [vmem:[%s4644_s1 + $0x1b0] sm:$0xff]  ;;  %v4917_v29 = vpack.c.bf16 %v4845_v6, %v4844_v38  ;;  %v520_v21 = vld [vmem:[%s4644_s1 + $0x1b8] sm:$0xff]  ;;  %v4919_v47 = vld [vmem:[#allocation14_spill] sm:$0xff] }
  0x75   :  { %v1515_v27 = vand.u32 4294901760, %v1514_v51  ;;  %v4732_v32 = vand.u32 4294901760, %v3794_v54  ;;  %v4735_v12 = vand.u32 4294901760, %v3814_v31  ;;  %v4738_v49 = vand.u32 4294901760, %v3816_v23  ;;  %2791 = vmatpush3.bf16.msra.mxu1 %v4919_v47  ;;  %v503_v51 = vld [vmem:[%s4644_s1 + $0x130] sm:$0xff] }
  0x76   :  { %v1508_v11 = vand.u32 4294901760, %v1507_v28  ;;  %4916 = vst [vmem:[#allocation11_spill] sm:$0xff] %v3840_v59  ;;  %2755 = vmatpush3.bf16.msra.mxu0 %v4917_v29  ;;  %v4918_v41 = vpack.c.bf16 %v4849_v34, %v4848_v52  ;;  %v3858_v39 = vsub.f32 %v518_v20, %v1455_v5  ;;  %v3860_v38 = vpack.c.bf16 %v1407_v44, %v1404_v42  ;;  %v4922_v29 = vld [vmem:[#allocation16_spill] sm:$0xff]  ;;  %v504_v5 = vld [vmem:[%s4644_s1 + $0x138] sm:$0xff] }
  0x77   :  { %v3862_v6 = vsub.f32 %v501_v50, %v1404_v42  ;;  %v4743_v28 = vand.u32 4294901760, %v3818_v37  ;;  %2793 = vmatprep.subr.bf16.mxu1 %v4922_v29  ;;  %v1633_v52 = vsub.f32 %v3794_v54, %v4732_v32  ;;  %v1640_v34 = vsub.f32 %v3814_v31, %v4735_v12 }
  0x78   :  { %2757 = vmatprep.subr.bf16.mxu0 %v4918_v41  ;;  %4920 = vst [vmem:[#allocation14_spill] sm:$0xff] %v3858_v39  ;;  %v1521_v20 = vsub.f32 %v3816_v23, %v4738_v49  ;;  %v1458_v50 = vand.u32 4294901760, %v519_v22  ;;  %v3881_v42 = vpack.c.bf16 %v1627_v58, %v1620_v43  ;;  %v3883_v41 = vsub.f32 %v502_v2, %v1407_v44  ;;  %v4926_v2 = vld [vmem:[#allocation17_spill] sm:$0xff] }
  0x79   :  { %4921 = vst [vmem:[#allocation37_spill] sm:$0xff] %v3862_v6  ;;  %v1528_v32 = vsub.f32 %v3818_v37, %v4743_v28  ;;  %v1461_v54 = vand.u32 4294901760, %v520_v21  ;;  %v4924_v12 = vpack.c.bf16 %v4851_v14, %v4850_v57  ;;  %v3891_v31 = vpack.c.bf16 %v1515_v27, %v1508_v11  ;;  %2795 = vmatpush3.bf16.msra.mxu1 %v4926_v2  ;;  %v521_v11 = vld [vmem:[%s4644_s1 + $0x1c0] sm:$0xff] }
  0x7a   :  { %4923 = vst [vmem:[#allocation16_spill] sm:$0xff] %v3883_v41  ;;  %v1634_v49 = vand.u32 4294901760, %v1633_v52  ;;  %v1641_v23 = vand.u32 4294901760, %v1640_v34  ;;  %v1410_v15 = vand.u32 4294901760, %v503_v51  ;;  %v4925_v43 = vpack.c.bf16 %v3271_v3, %v3267_v61  ;;  %v4927_v57 = vld [vmem:[#allocation18_spill] sm:$0xff]  ;;  %v522_v3 = vld [vmem:[%s4644_s1 + $0x1c8] sm:$0xff] }
  0x7b   :  { %2759 = vmatpush3.bf16.msra.mxu0 %v4924_v12  ;;  %v3897_v44 = vpack.c.bf16 %v1461_v54, %v1458_v50  ;;  %v1413_v58 = vand.u32 4294901760, %v504_v5  ;;  %v4748_v28 = vand.u32 4294901760, %v3840_v59  ;;  %v4749_v37 = vand.u32 4294901760, %v3858_v39  ;;  %2797 = vmatprep.subr.bf16.mxu1 %v4927_v57  ;;  %v505_v52 = vld [vmem:[%s4644_s1 + $0x140] sm:$0xff] }
  0x7c   :  { %2761 = vmatprep.subr.bf16.mxu0 %v4925_v43  ;;  %v1522_v14 = vand.u32 4294901760, %v1521_v20  ;;  %v1529_v27 = vand.u32 4294901760, %v1528_v32  ;;  %v3905_v12 = vsub.f32 %v519_v22, %v1458_v50  ;;  %v3914_v34 = vsub.f32 %v520_v21, %v1461_v54  ;;  %v4934_v32 = vld [vmem:[#allocation19_spill] sm:$0xff] }
  0x7d   :  { %v1647_v43 = vsub.f32 %v3840_v59, %v4748_v28  ;;  %v1654_v22 = vsub.f32 %v3858_v39, %v4749_v37  ;;  %v4930_v20 = vpack.c.bf16 %v3283_v10, %v3281_v8  ;;  %v3926_v50 = vpack.c.bf16 %v1641_v23, %v1634_v49  ;;  %v506_v28 = vld [vmem:[%s4644_s1 + $0x148] sm:$0xff]  ;;  %2799 = vmatpush3.bf16.msra.mxu1 %v4934_v32 }
  0x7e   :  { %4928 = vst [vmem:[#allocation17_spill] sm:$0xff] %v3905_v12  ;;  %4929 = vst [vmem:[#allocation18_spill] sm:$0xff] %v3914_v34  ;;  %v3928_v61 = vsub.f32 %v503_v51, %v1410_v15  ;;  %v4932_v54 = vand.u32 4294901760, %v3862_v6  ;;  %v1464_v18 = vand.u32 4294901760, %v521_v11  ;;  %v4933_v37 = vpack.c.bf16 %v3313_v0, %v3311_v62  ;;  %v523_v62 = vld [vmem:[%s4644_s1 + $0x1d0] sm:$0xff] }
  0x7f   :  { %2763 = vmatpush3.bf16.msra.mxu0 %v4930_v20  ;;  %v3940_v8 = vsub.f32 %v504_v5, %v1413_v58  ;;  %v4936_v10 = vand.u32 4294901760, %v3883_v41  ;;  %v1467_v49 = vand.u32 4294901760, %v522_v3  ;;  %v1416_v51 = vand.u32 4294901760, %v505_v52  ;;  %v4937_v20 = vld [vmem:[#allocation20_spill] sm:$0xff] }
  0x80   :  { %4931 = vst [vmem:[#allocation38_spill] sm:$0xff] %v3928_v61  ;;  %v1535_v21 = vsub.f32 %v3862_v6, %v4932_v54  ;;  %2765 = vmatprep.subr.bf16.mxu0 %v4933_v37  ;;  %2801 = vmatprep.subr.bf16.mxu1 %v4937_v20  ;;  %v3946_v54 = vpack.c.bf16 %v1529_v27, %v1522_v14  ;;  %v1648_v39 = vand.u32 4294901760, %v1647_v43  ;;  %v1655_v59 = vand.u32 4294901760, %v1654_v22 }
  0x81   :  { %4935 = vst [vmem:[#allocation19_spill] sm:$0xff] %v3940_v8  ;;  %v1542_v23 = vsub.f32 %v3883_v41, %v4936_v10  ;;  %v3948_v6 = vpack.c.bf16 %v1413_v58, %v1410_v15  ;;  %v3953_v37 = vpack.c.bf16 %v1467_v49, %v1464_v18  ;;  %v3955_v5 = vsub.f32 %v521_v11, %v1464_v18  ;;  %v524_v41 = vld [vmem:[%s4644_s1 + $0x1d8] sm:$0xff] }
  0x82   :  { %v1536_v0 = vand.u32 4294901760, %v1535_v21  ;;  %v1419_v10 = vand.u32 4294901760, %v506_v28  ;;  %v4941_v15 = vpack.c.bf16 %v3331_v13, %v3316_v25  ;;  %v4759_v14 = vand.u32 4294901760, %v3905_v12  ;;  %v4943_v11 = vld [vmem:[#allocation21_spill] sm:$0xff] }
  0x83   :  { %4938 = vst [vmem:[#allocation20_spill] sm:$0xff] %v3948_v6  ;;  %4939 = vst [vmem:[#allocation39_spill] sm:$0xff] %v3953_v37  ;;  %v1543_v58 = vand.u32 4294901760, %v1542_v23  ;;  %v4762_v27 = vand.u32 4294901760, %v3914_v34  ;;  %v4763_v43 = vand.u32 4294901760, %v3928_v61  ;;  %v4942_v18 = vpack.c.bf16 %v3355_v63, %v3353_v24  ;;  %2803 = vmatpush3.bf16.msra.mxu1 %v4943_v11  ;;  %v507_v23 = vld [vmem:[%s4644_s1 + $0x150] sm:$0xff] }
  0x84   :  { %4940 = vst [vmem:[#allocation40_spill] sm:$0xff] %v3955_v5  ;;  %2767 = vmatpush3.bf16.msra.mxu0 %v4941_v15  ;;  %v3970_v22 = vsub.f32 %v522_v3, %v1467_v49  ;;  %v3972_v21 = vsub.f32 %v505_v52, %v1416_v51  ;;  %v1470_v13 = vand.u32 4294901760, %v523_v62  ;;  %v4946_v15 = vld [vmem:[#allocation24_spill] sm:$0xff]  ;;  %v1661_v63 = vsub.f32 %v3905_v12, %v4759_v14  ;;  %v508_v49 = vld [vmem:[%s4644_s1 + $0x158] sm:$0xff] }
  0x85   :  { %2769 = vmatprep.subr.bf16.mxu0 %v4942_v18  ;;  %2805 = vmatprep.subr.bf16.mxu1 %v4946_v15  ;;  %v1668_v24 = vsub.f32 %v3914_v34, %v4762_v27  ;;  %v1549_v3 = vsub.f32 %v3928_v61, %v4763_v43  ;;  %v1473_v52 = vand.u32 4294901760, %v524_v41  ;;  %v3991_v18 = vpack.c.bf16 %v1655_v59, %v1648_v39  ;;  %v4953_v39 = vld [vmem:[#allocation25_spill] sm:$0xff] }
  0x86   :  { %4944 = vst [vmem:[#allocation21_spill] sm:$0xff] %v3970_v22  ;;  %4945 = vst [vmem:[#allocation41_spill] sm:$0xff] %v3972_v21  ;;  %v3993_v25 = vpack.c.bf16 %v1419_v10, %v1416_v51  ;;  %v3995_v37 = vsub.f32 %v506_v28, %v1419_v10  ;;  %v4949_v14 = vand.u32 4294901760, %v3940_v8  ;;  %v4950_v27 = vpack.c.bf16 %v4847_v17, %v4846_v36  ;;  %v525_v36 = vld [vmem:[%s4644_s1 + $0x1e0] sm:$0xff]  ;;  %v526_v17 = vld [vmem:[%s4644_s1 + $0x1e8] sm:$0xff] }
  0x87   :  { %v4003_v43 = vpack.c.bf16 %v1543_v58, %v1536_v0  ;;  %v1662_v61 = vand.u32 4294901760, %v1661_v63  ;;  %v4005_v34 = vpack.c.bf16 %v1473_v52, %v1470_v13  ;;  %v1422_v6 = vand.u32 4294901760, %v507_v23  ;;  %2807 = vmatpush3.bf16.msra.mxu1 %v4953_v39 }
  0x88   :  { %4947 = vst [vmem:[#allocation24_spill] sm:$0xff] %v3993_v25  ;;  %4948 = vst [vmem:[#allocation42_spill] sm:$0xff] %v3995_v37  ;;  %v1556_v12 = vsub.f32 %v3940_v8, %v4949_v14  ;;  %2771 = vmatpush3.bf16.msra.mxu0 %v4950_v27  ;;  %v4952_v59 = vpack.c.bf16 %v3397_v33, %v3395_v53  ;;  %v1669_v28 = vand.u32 4294901760, %v1668_v24  ;;  %v1425_v51 = vand.u32 4294901760, %v508_v49  ;;  %v4026_v27 = vld [vmem:[%s4644_s1 + $0x160] sm:$0xff]  ;;  %v4207_v8 = vld [vmem:[%s4645_s0 + $0x58] sm:$0xff] }
  0x89   :  { %4951 = vst [vmem:[#allocation43_spill] sm:$0xff] %v4005_v34  ;;  %v4770_v10 = vand.u32 4294901760, %v3955_v5  ;;  %v4769_v14 = vand.u32 4294901760, %v3970_v22  ;;  %2841 = vmatprep.subr.bf16.mxu1 %v4852_v60  ;;  %v1550_v33 = vand.u32 4294901760, %v1549_v3  ;;  %v4020_v0 = vsub.f32 %v523_v62, %v1470_v13  ;;  %4955 = vst [vmem:[#allocation44_spill] sm:$0xff] %v4026_v27 }
  0x8a   :  { %2773 = vmatprep.subr.bf16.mxu0 %v4952_v59  ;;  %v1557_v53 = vand.u32 4294901760, %v1556_v12  ;;  %v4772_v58 = vand.u32 4294901760, %v3972_v21  ;;  %v4028_v63 = vsub.f32 %v524_v41, %v1473_v52  ;;  %v4771_v12 = vand.u32 4294901760, %v3995_v37 }
  0x8b   :  { %4954 = vst [vmem:[#allocation25_spill] sm:$0xff] %v4020_v0  ;;  %v1675_v24 = vsub.f32 %v3955_v5, %v4770_v10  ;;  %v1682_v60 = vsub.f32 %v3970_v22, %v4769_v14  ;;  %v4957_v62 = vpack.c.bf16 %v3416_v48, %v3400_v1  ;;  %v4958_v13 = vand.u32 4294901760, %v3624_v45  ;;  %v4050_v14 = vld [vmem:[%s4644_s1 + $0x168] sm:$0xff] }
  0x8c   :  { %4956 = vst [vmem:[#allocation45_spill] sm:$0xff] %v4028_v63  ;;  %v4042_v3 = vsub.f32 %v507_v23, %v1422_v6  ;;  %v1563_v41 = vsub.f32 %v3972_v21, %v4772_v58  ;;  %v1476_v52 = vand.u32 4294901760, %v525_v36  ;;  %v1479_v59 = vand.u32 4294901760, %v526_v17  ;;  %4960 = vst [vmem:[#allocation47_spill] sm:$0xff] %v4050_v14 }
  0x8d   :  { %2775 = vmatpush3.bf16.msra.mxu0 %v4957_v62  ;;  %1114 = vmatmul.mubr.f32.vlgmr.msra.gmra.mrb[2].mxu1 %v4958_v13  ;;  %v4054_v1 = vpack.c.bf16 %v1669_v28, %v1662_v61  ;;  %v4056_v48 = vsub.f32 %v508_v49, %v1425_v51  ;;  %v1570_v23 = vsub.f32 %v3995_v37, %v4771_v12  ;;  %v4773_v62 = vand.u32 4294901760, %v4026_v27  ;;  %v4071_v61 = vld [vmem:[%s4644_s1 + $0x1f0] sm:$0xff]  ;;  %v4076_v49 = vld [vmem:[%s4644_s1 + $0x1f8] sm:$0xff] }
  0x8e   :  { %4959 = vst [vmem:[#allocation46_spill] sm:$0xff] %v4042_v3  ;;  %2809 = vmatprep.subr.bf16.mxu0 %v3650_v46  ;;  %2843 = vmatpush3.bf16.msra.mxu1 %v4878_v40  ;;  %v4064_v13 = vpack.c.bf16 %v1557_v53, %v1550_v33  ;;  %v4066_v10 = vpack.c.bf16 %v1425_v51, %v1422_v6  ;;  %v1676_v46 = vand.u32 4294901760, %v1675_v24  ;;  %v1683_v40 = vand.u32 4294901760, %v1682_v60  ;;  %v4087_v51 = vld [vmem:[%s4644_s1 + $0x170] sm:$0xff] }
  0x8f   :  { %4961 = vst [vmem:[#allocation48_spill] sm:$0xff] %v4056_v48  ;;  %2845 = vmatprep.subr.bf16.mxu1 %v4880_v19  ;;  %1384 = vmatprep.mubr.f32.mxu1 %v3592_v7  ;;  %4963 = vst [vmem:[#allocation50_spill] sm:$0xff] %v4071_v61  ;;  %v1564_v19 = vand.u32 4294901760, %v1563_v41  ;;  %v4079_v28 = vsub.f32 %v525_v36, %v1476_v52  ;;  %v4081_v33 = vsub.f32 %v526_v17, %v1479_v59  ;;  %v4107_v41 = vld [vmem:[%s4644_s1 + $0x178] sm:$0xff] }
  0x90   :  { %4962 = vst [vmem:[#allocation49_spill] sm:$0xff] %v4066_v10  ;;  %4964 = vst [vmem:[#allocation51_spill] sm:$0xff] %v4076_v49  ;;  %1006 = vmatmul.mubr.f32.vlgmr.msra.gmra.mrb[2].mxu0 %v3624_v45  ;;  %v4777_v6 = vand.u32 4294901760, %v4050_v14  ;;  %v1571_v53 = vand.u32 4294901760, %v1570_v23  ;;  %v4774_v24 = vand.u32 4294901760, %v4020_v0  ;;  %v4775_v45 = vand.u32 4294901760, %v4028_v63 }
  0x91   :  { %4965 = vst [vmem:[#allocation52_spill] sm:$0xff] %v4079_v28  ;;  %4966 = vst [vmem:[#allocation53_spill] sm:$0xff] %v4081_v33  ;;  %2811 = vmatpush3.bf16.msra.mxu0 %v3656_v55  ;;  %1280 = vmatprep.mubr.f32.mxu0 %v3592_v7  ;;  %v4776_v36 = vand.u32 4294901760, %v4042_v3  ;;  %v4099_v17 = vsub.f32 %v4026_v27, %v4773_v62  ;;  %v4780_v55 = vand.u32 4294901760, %v4056_v48  ;;  %v4782_v22 = vand.u32 4294901760, %v4081_v33 }
  0x92   :  { %4967 = vst [vmem:[#allocation54_spill] sm:$0xff] %v4087_v51  ;;  %2813 = vmatprep.subr.bf16.mxu0 %v3662_v16  ;;  %2847 = vmatpush3.bf16.msra.mxu1 %v4892_v30  ;;  %4969 = vst [vmem:[#allocation56_spill] sm:$0xff] %v4107_v41  ;;  %v1689_v16 = vsub.f32 %v4020_v0, %v4774_v24  ;;  %v1696_v30 = vsub.f32 %v4028_v63, %v4775_v45  ;;  %v4972_v45 = vld [vmem:[#allocation8_spill] sm:$0xff]  ;;  %v4252_v63 = vld [vmem:[%s4645_s0 + $0xb8] sm:$0xff] }
  0x93   :  { %4968 = vst [vmem:[#allocation55_spill] sm:$0xff] %v4099_v17  ;;  %2849 = vmatprep.subr.bf16.mxu1 %v4902_v9  ;;  %v1577_v23 = vsub.f32 %v4042_v3, %v4776_v36  ;;  %v4120_v58 = vpack.c.bf16 %v1683_v40, %v1676_v46  ;;  %v4122_v62 = vpack.c.bf16 %v1479_v59, %v1476_v52  ;;  %v4973_v46 = vld [vmem:[#allocation2_spill] sm:$0xff]  ;;  %v4974_v52 = vld [vmem:[#allocation7_spill] sm:$0xff] }
  0x94   :  { %v4127_v9 = vsub.f32 %v4050_v14, %v4777_v6  ;;  %v1584_v24 = vsub.f32 %v4056_v48, %v4780_v55  ;;  %v1690_v60 = vand.u32 4294901760, %v1689_v16  ;;  %v1697_v7 = vand.u32 4294901760, %v1696_v30  ;;  %v4236_v48 = vld [vmem:[%s4645_s0 + $0xa8] sm:$0xff] }
  0x95   :  { %4970 = vst [vmem:[#allocation57_spill] sm:$0xff] %v4122_v62  ;;  %2815 = vmatpush3.bf16.msra.mxu0 %v4972_v45  ;;  %v1578_v36 = vand.u32 4294901760, %v1577_v23  ;;  %v4136_v59 = vpack.c.bf16 %v1571_v53, %v1564_v19  ;;  %v4781_v6 = vand.u32 4294901760, %v4079_v28  ;;  %v4143_v45 = vld [vmem:[%s4645_s0 + $0x8] sm:$0xff]  ;;  %v4975_v16 = vand.u32 4294901760, %v4071_v61 }
  0x96   :  { %4971 = vst [vmem:[#allocation58_spill] sm:$0xff] %v4127_v9  ;;  %2817 = vmatprep.subr.bf16.mxu0 %v4973_v46  ;;  %2851 = vmatpush3.bf16.msra.mxu1 %v4974_v52  ;;  %v1585_v40 = vand.u32 4294901760, %v1584_v24  ;;  %v4976_v19 = vand.u32 4294901760, %v4076_v49  ;;  %v4977_v24 = vand.u32 4294901760, %v4087_v51  ;;  %v4170_v52 = vld [vmem:[%s4645_s0 + $0x28] sm:$0xff]  ;;  %v4184_v46 = vld [vmem:[%s4645_s0 + $0x38] sm:$0xff] }
  0x97   :  { %2853 = vmatprep.subr.bf16.mxu1 %v4915_v4  ;;  %v4149_v30 = vsub.f32 %v4071_v61, %v4975_v16  ;;  %v4165_v4 = vld [vmem:[%s4645_s0 + $0x18] sm:$0xff]  ;;  %v4172_v16 = vpack.c.bf16 %v1697_v7, %v1690_v60  ;;  %v4189_v7 = vld [vmem:[%s4645_s0 + $0x48] sm:$0xff]  ;;  %v4981_v55 = vand.u32 4294901760, %v4099_v17  ;;  %v66_v0 = vcombine.high %v4184_v46, %v4184_v46 }
  0x98   :  { %v4154_v53 = vsub.f32 %v4076_v49, %v4976_v19  ;;  %v4159_v23 = vsub.f32 %v4087_v51, %v4977_v24  ;;  %v1703_v19 = vsub.f32 %v4079_v28, %v4781_v6  ;;  %v1710_v24 = vsub.f32 %v4081_v33, %v4782_v22  ;;  %v4978_v60 = vld [vmem:[#allocation3_spill] sm:$0xff]  ;;  %v4226_v33 = vld [vmem:[%s4645_s0 + $0x78] sm:$0xff] }
  0x99   :  { %2819 = vmatpush3.bf16.msra.mxu0 %v4978_v60  ;;  %v4192_v12 = vpack.c.bf16 %v1585_v40, %v1578_v36  ;;  %v4980_v6 = vand.u32 4294901760, %v4107_v41  ;;  %v4202_v5 = vsub.f32 %v4099_v17, %v4981_v55  ;;  %v4212_v36 = vld [vmem:[%s4645_s0 + $0x68] sm:$0xff]  ;;  %v60_v40 = vcombine.high %v4143_v45, %v4143_v45  ;;  %v4983_v55 = vld [vmem:[#allocation5_spill] sm:$0xff] }
  0x9a   :  { %2821 = vmatprep.subr.bf16.mxu0 %v4983_v55  ;;  %2855 = vmatpush3.bf16.msra.mxu1 %v4919_v47  ;;  %v1704_v60 = vand.u32 4294901760, %v1703_v19  ;;  %v1711_v17 = vand.u32 4294901760, %v1710_v24  ;;  %v4231_v28 = vld [vmem:[%s4645_s0 + $0x98] sm:$0xff]  ;;  %v62_v47 = vcombine.high %v4165_v4, %v4165_v4  ;;  %v64_v19 = vcombine.high %v4170_v52, %v4170_v52  ;;  %v4987_v49 = vld [vmem:[#allocation31_spill] sm:$0xff] }
  0x9b   :  { %4979 = vst [vmem:[#allocation8_spill] sm:$0xff] %v4192_v12  ;;  %v4197_v22 = vsub.f32 %v4107_v41, %v4980_v6  ;;  %4982 = vst [vmem:[#allocation2_spill] sm:$0xff] %v4202_v5  ;;  %v4217_v6 = vld [vmem:[%s4645_s0 + $0x88] sm:$0xff]  ;;  %2857 = vmatprep.subr.bf16.mxu1 %v4922_v29  ;;  %v4984_v55 = vand.u32 4294901760, %v4127_v9  ;;  %v68_v37 = vcombine.high %v4189_v7, %v4189_v7  ;;  %v123_v14 = vsel %vm107_vm0, %v60_v40, 0.0  ;;  %v4988_v40 = vld [vmem:[#allocation9_spill] sm:$0xff] }
  0x9c   :  { %v4258_v21 = vpack.c.bf16 %v1711_v17, %v1704_v60  ;;  %v70_v29 = vcombine.high %v4207_v8, %v4207_v8  ;;  %v76_v24 = vcombine.high %v4217_v6, %v4217_v6  ;;  %v74_v41 = vcombine.high %v4226_v33, %v4226_v33 }
  0x9d   :  { %v4247_v3 = vsub.f32 %v4127_v9, %v4984_v55  ;;  %v72_v55 = vcombine.high %v4212_v36, %v4212_v36  ;;  %v4986_v9 = vld [vmem:[#allocation30_spill] sm:$0xff]  ;;  %v78_v51 = vcombine.high %v4231_v28, %v4231_v28  ;;  %v80_v17 = vcombine.high %v4236_v48, %v4236_v48 }
  0x9e   :  { %4985 = vst [vmem:[#allocation7_spill] sm:$0xff] %v4258_v21  ;;  %2823 = vmatpush3.bf16.msra.mxu0 %v4986_v9  ;;  %v118_v60 = vsel %vm107_vm0, %v4143_v45, 0.0  ;;  %2859 = vmatpush3.bf16.msra.mxu1 %v4926_v2  ;;  %v82_v61 = vcombine.high %v4252_v63, %v4252_v63  ;;  %v119_v9 = vsel %vm107_vm0, %v4189_v7, 0.0  ;;  %v121_v62 = vsel %vm107_vm0, %v4217_v6, 0.0 }
  0x9f   :  { %2825 = vmatprep.subr.bf16.mxu0 %v4987_v49  ;;  %2861 = vmatprep.subr.bf16.mxu1 %v4927_v57  ;;  %v120_v27 = vadd.f32 %v119_v9, %v118_v60  ;;  %v124_v10 = vsel %vm107_vm0, %v68_v37, 0.0  ;;  %v126_v49 = vsel %vm107_vm0, %v76_v24, 0.0  ;;  %v138_v2 = vsel %vm107_vm0, %v4165_v4, 0.0  ;;  %v4989_v9 = vld [vmem:[#allocation22_spill] sm:$0xff] }
  0xa0   :  { %v125_v21 = vadd.f32 %v124_v10, %v123_v14  ;;  %v139_v12 = vsel %vm107_vm0, %v4207_v8, 0.0  ;;  %v141_v34 = vsel %vm107_vm0, %v4231_v28, 0.0  ;;  %v143_v5 = vsel %vm107_vm0, %v62_v47, 0.0 }
  0xa1   :  { %v122_v57 = vadd.f32 %v121_v62, %v120_v27  ;;  %v140_v60 = vadd.f32 %v139_v12, %v138_v2  ;;  %v144_v37 = vsel %vm107_vm0, %v70_v29, 0.0  ;;  %v146_v24 = vsel %vm107_vm0, %v78_v51, 0.0 }
  0xa2   :  { %2827 = vmatpush3.bf16.msra.mxu0 %v4988_v40  ;;  %2863 = vmatpush3.bf16.msra.mxu1 %v4934_v32  ;;  %v127_v10 = vadd.f32 %v126_v49, %v125_v21  ;;  %v145_v14 = vadd.f32 %v144_v37, %v143_v5  ;;  %v158_v25 = vsel %vm107_vm0, %v4170_v52, 0.0  ;;  %v159_v47 = vsel %vm107_vm0, %v4212_v36, 0.0  ;;  %v4990_v49 = vld [vmem:[#allocation23_spill] sm:$0xff] }
  0xa3   :  { %2829 = vmatprep.subr.bf16.mxu0 %v4989_v9  ;;  %2865 = vmatprep.subr.bf16.mxu1 %v4937_v20  ;;  %v142_v27 = vadd.f32 %v141_v34, %v140_v60  ;;  %v160_v12 = vadd.f32 %v159_v47, %v158_v25  ;;  %v161_v62 = vsel %vm107_vm0, %v4236_v48, 0.0  ;;  %v163_v51 = vsel %vm107_vm0, %v64_v19, 0.0  ;;  %v4991_v25 = vld [vmem:[#allocation10_spill] sm:$0xff] }
  0xa4   :  { %v147_v29 = vadd.f32 %v146_v24, %v145_v14  ;;  %v164_v32 = vsel %vm107_vm0, %v72_v55, 0.0  ;;  %v166_v5 = vsel %vm107_vm0, %v80_v17, 0.0  ;;  %v178_v21 = vsel %vm107_vm0, %v4184_v46, 0.0 }
  0xa5   :  { %v162_v2 = vadd.f32 %v161_v62, %v160_v12  ;;  %v165_v40 = vadd.f32 %v164_v32, %v163_v51  ;;  %v179_v34 = vsel %vm107_vm0, %v4226_v33, 0.0  ;;  %v181_v20 = vsel %vm107_vm0, %v4252_v63, 0.0  ;;  %v4992_v32 = vld [vmem:[#allocation12_spill] sm:$0xff] }
  0xa6   :  { %2831 = vmatpush3.bf16.msra.mxu0 %v4990_v49  ;;  %2867 = vmatpush3.bf16.msra.mxu1 %v4943_v11  ;;  %v180_v19 = vadd.f32 %v179_v34, %v178_v21  ;;  %v183_v55 = vsel %vm107_vm0, %v66_v0, 0.0  ;;  %v184_v17 = vsel %vm107_vm0, %v74_v41, 0.0  ;;  %v186_v60 = vsel %vm107_vm0, %v82_v61, 0.0  ;;  %v4993_v41 = vld [vmem:[#allocation13_spill] sm:$0xff] }
  0xa7   :  { %2833 = vmatprep.subr.bf16.mxu0 %v4991_v25  ;;  %2869 = vmatprep.subr.bf16.mxu1 %v4946_v15  ;;  %v167_v37 = vadd.f32 %v166_v5, %v165_v40  ;;  %v185_v24 = vadd.f32 %v184_v17, %v183_v55  ;;  %v191_v9 = vmul.f32 0.33333334, %v122_v57  ;;  %v192_v14 = vmul.f32 0.33333334, %v127_v10  ;;  %v4994_v25 = vld [vmem:[#allocation15_spill] sm:$0xff] }
  0xa8   :  { %v182_v47 = vadd.f32 %v181_v20, %v180_v19  ;;  %v195_v12 = vmul.f32 0.33333334, %v142_v27  ;;  %v196_v62 = vmul.f32 0.33333334, %v147_v29  ;;  %v199_v51 = vmul.f32 0.33333334, %v162_v2 }
  0xa9   :  { %v1599_v11 = vand.u32 4294901760, %v4247_v3  ;;  %v187_v21 = vadd.f32 %v186_v60, %v185_v24  ;;  %v200_v0 = vmul.f32 0.33333334, %v167_v37  ;;  %v222_v49 = vcombine.low %v191_v9, %v192_v14  ;;  %v4995_v19 = vld [vmem:[#allocation26_spill] sm:$0xff]  ;;  %v4997_v14 = vld [vmem:[#allocation32_spill] sm:$0xff] }
  0xaa   :  { %2835 = vmatpush3.bf16.msra.mxu0 %v4992_v32  ;;  %2871 = vmatpush3.bf16.msra.mxu1 %v4953_v39  ;;  %v203_v15 = vmul.f32 0.33333334, %v182_v47  ;;  %v224_v61 = vcombine.low %v195_v12, %v196_v62  ;;  %v1716_v57 = vand.u32 4294901760, %v4149_v30  ;;  %v1723_v10 = vand.u32 4294901760, %v4154_v53 }
  0xab   :  { %2837 = vmatprep.subr.bf16.mxu0 %v4993_v41  ;;  %2905 = vmatprep.subr.bf16.mxu1 %v3881_v42  ;;  %v204_v27 = vmul.f32 0.33333334, %v187_v21  ;;  %v226_v29 = vcombine.low %v199_v51, %v200_v0  ;;  %v238_v5 = vsub.f32 %v4143_v45, %v222_v49  ;;  %v246_v2 = vsub.f32 %v4189_v7, %v222_v49  ;;  %v4996_v7 = vld [vmem:[#allocation6_spill] sm:$0xff] }
  0xac   :  { %v240_v40 = vsub.f32 %v4165_v4, %v224_v61  ;;  %v248_v34 = vsub.f32 %v4207_v8, %v224_v61  ;;  %v254_v39 = vsub.f32 %v4217_v6, %v222_v49  ;;  %v256_v20 = vsub.f32 %v4231_v28, %v224_v61 }
  0xad   :  { %1386 = vmatmul.mubr.f32.vlgmr.msra.gmra.mrb[4].mxu1 %v4995_v19  ;;  %v228_v55 = vcombine.low %v203_v15, %v204_v27  ;;  %v242_v42 = vsub.f32 %v4170_v52, %v226_v29  ;;  %v250_v17 = vsub.f32 %v4212_v36, %v226_v29  ;;  %v1604_v45 = vand.u32 4294901760, %v4159_v23 }
  0xae   :  { %2839 = vmatpush3.bf16.msra.mxu0 %v4994_v25  ;;  %2907 = vmatpush3.bf16.msra.mxu1 %v3891_v31  ;;  %v258_v8 = vsub.f32 %v4236_v48, %v226_v29  ;;  %v262_v4 = vmul.f32 %v238_v5, %v238_v5  ;;  %v4343_v6 = vmul.f32 %v240_v40, %v240_v40  ;;  %v1611_v28 = vand.u32 4294901760, %v4197_v22 }
  0xaf   :  { %2873 = vmatprep.subr.bf16.mxu0 %v4996_v7  ;;  %2909 = vmatprep.subr.bf16.mxu1 %v3926_v50  ;;  %v244_v60 = vsub.f32 %v4184_v46, %v228_v55  ;;  %v252_v52 = vsub.f32 %v4226_v33, %v228_v55  ;;  %v260_v36 = vsub.f32 %v4252_v63, %v228_v55 }
  0xb0   :  { %v4350_v37 = vmul.f32 %v242_v42, %v242_v42  ;;  %v270_v31 = vmul.f32 %v246_v2, %v246_v2  ;;  %v272_v24 = vmul.f32 %v248_v34, %v248_v34  ;;  %v4353_v48 = vmul.f32 %v250_v17, %v250_v17 }
  0xb1   :  { %1282 = vmatmul.mubr.f32.vlgmr.msra.gmra.mrb[4].mxu0 %v4995_v19  ;;  %v278_v9 = vmul.f32 %v254_v39, %v254_v39  ;;  %v4356_v47 = vmul.f32 %v244_v60, %v244_v60  ;;  %v4358_v50 = vmul.f32 %v252_v52, %v252_v52  ;;  %v280_v46 = vmul.f32 %v256_v20, %v256_v20 }
  0xb2   :  { %2875 = vmatpush3.bf16.msra.mxu0 %v4997_v14  ;;  %v4360_v12 = vmul.f32 %v258_v8, %v258_v8  ;;  %2911 = vmatpush3.bf16.msra.mxu1 %v3946_v54  ;;  %v4364_v63 = vmul.f32 %v260_v36, %v260_v36  ;;  %v310_v33 = vcombine.high %v262_v4, %v262_v4  ;;  %v367_v51 = vsel %vm107_vm0, %v262_v4, 0.0 }
  0xb3   :  { %2877 = vmatprep.subr.bf16.mxu0 %v3834_v35  ;;  %v312_v62 = vcombine.high %v4343_v6, %v4343_v6  ;;  %2913 = vmatprep.subr.bf16.mxu1 %v3991_v18  ;;  %v314_v32 = vcombine.high %v4350_v37, %v4350_v37  ;;  %v316_v21 = vcombine.high %v4356_v47, %v4356_v47  ;;  %v368_v52 = vsel %vm107_vm0, %v270_v31, 0.0 }
  0xb4   :  { %v318_v0 = vcombine.high %v270_v31, %v270_v31  ;;  %v320_v49 = vcombine.high %v272_v24, %v272_v24  ;;  %v322_v54 = vcombine.high %v4353_v48, %v4353_v48  ;;  %v324_v41 = vcombine.high %v4358_v50, %v4358_v50 }
  0xb5   :  { %v326_v15 = vcombine.high %v278_v9, %v278_v9  ;;  %v328_v61 = vcombine.high %v280_v46, %v280_v46  ;;  %v330_v18 = vcombine.high %v4360_v12, %v4360_v12  ;;  %v332_v27 = vcombine.high %v4364_v63, %v4364_v63 }
  0xb6   :  { %2879 = vmatpush3.bf16.msra.mxu0 %v3836_v26  ;;  %v372_v29 = vsel %vm107_vm0, %v310_v33, 0.0  ;;  %v373_v5 = vsel %vm107_vm0, %v318_v0, 0.0  ;;  %2915 = vmatpush3.bf16.msra.mxu1 %v4003_v43  ;;  %v392_v34 = vsel %vm107_vm0, %v312_v62, 0.0  ;;  %v393_v39 = vsel %vm107_vm0, %v320_v49, 0.0 }
  0xb7   :  { %2881 = vmatprep.subr.bf16.mxu0 %v3838_v56  ;;  %v374_v2 = vadd.f32 %v373_v5, %v372_v29  ;;  %v375_v40 = vsel %vm107_vm0, %v326_v15, 0.0  ;;  %2917 = vmatprep.subr.bf16.mxu1 %v4054_v1  ;;  %v394_v20 = vadd.f32 %v393_v39, %v392_v34  ;;  %v395_v25 = vsel %vm107_vm0, %v328_v61, 0.0  ;;  %v4998_v61 = vld [vmem:[#allocation20_spill] sm:$0xff] }
  0xb8   :  { %v412_v19 = vsel %vm107_vm0, %v314_v32, 0.0  ;;  %v413_v55 = vsel %vm107_vm0, %v322_v54, 0.0  ;;  %v415_v43 = vsel %vm107_vm0, %v330_v18, 0.0  ;;  %v432_v8 = vsel %vm107_vm0, %v316_v21, 0.0 }
  0xb9   :  { %v376_v42 = vadd.f32 %v375_v40, %v374_v2  ;;  %v414_v17 = vadd.f32 %v413_v55, %v412_v19  ;;  %v396_v4 = vadd.f32 %v395_v25, %v394_v20  ;;  %v433_v60 = vsel %vm107_vm0, %v324_v41, 0.0  ;;  %v5000_v20 = vld [vmem:[#allocation24_spill] sm:$0xff]  ;;  %v5003_v19 = vld [vmem:[#allocation43_spill] sm:$0xff] }
  0xba   :  { %2883 = vmatpush3.bf16.msra.mxu0 %v3860_v38  ;;  %v435_v1 = vsel %vm107_vm0, %v332_v27, 0.0  ;;  %2919 = vmatpush3.bf16.msra.mxu1 %v4064_v13  ;;  %v434_v33 = vadd.f32 %v433_v60, %v432_v8  ;;  %v369_v32 = vadd.f32 %v368_v52, %v367_v51  ;;  %v370_v0 = vsel %vm107_vm0, %v278_v9, 0.0  ;;  %v4999_v27 = vld [vmem:[#allocation39_spill] sm:$0xff]  ;;  %v5004_v55 = vld [vmem:[#allocation8_spill] sm:$0xff] }
  0xbb   :  { %2885 = vmatprep.subr.bf16.mxu0 %v3897_v44  ;;  %v416_v36 = vadd.f32 %v415_v43, %v414_v17  ;;  %v458_v62 = vsel %vm107_vm0, %v376_v42, 0.0  ;;  %2921 = vmatprep.subr.bf16.mxu1 %v4120_v58  ;;  %v459_v21 = vsel %vm107_vm0, %v396_v4, 0.0  ;;  %v387_v49 = vsel %vm107_vm0, %v4343_v6, 0.0 }
  0xbc   :  { %v388_v31 = vsel %vm107_vm0, %v272_v24, 0.0  ;;  %v436_v54 = vadd.f32 %v435_v1, %v434_v33  ;;  %v460_v41 = vadd.f32 %v459_v21, %v458_v62  ;;  %v371_v15 = vadd.f32 %v370_v0, %v369_v32  ;;  %v5006_v62 = vld [vmem:[#allocation49_spill] sm:$0xff]  ;;  %v5007_v32 = vld [vmem:[#allocation44_spill] sm:$0xff]  ;;  %v5009_v0 = vld [vmem:[#allocation47_spill] sm:$0xff] }
  0xbd   :  { %v461_v13 = vsel %vm107_vm0, %v416_v36, 0.0  ;;  %v389_v18 = vadd.f32 %v388_v31, %v387_v49  ;;  %v390_v51 = vsel %vm107_vm0, %v280_v46, 0.0  ;;  %v407_v58 = vsel %vm107_vm0, %v4350_v37, 0.0 }
  0xbe   :  { %2887 = vmatpush3.bf16.msra.mxu0 %v4998_v61  ;;  %v408_v9 = vsel %vm107_vm0, %v4353_v48, 0.0  ;;  %2923 = vmatpush3.bf16.msra.mxu1 %v4136_v59  ;;  %v462_v6 = vadd.f32 %v461_v13, %v460_v41  ;;  %v463_v24 = vsel %vm107_vm0, %v436_v54, 0.0  ;;  %v410_v5 = vsel %vm107_vm0, %v4360_v12, 0.0  ;;  %v5001_v12 = vld [vmem:[#allocation2_spill] sm:$0xff] }
  0xbf   :  { %2889 = vmatprep.subr.bf16.mxu0 %v4999_v27  ;;  %v409_v29 = vadd.f32 %v408_v9, %v407_v58  ;;  %2925 = vmatprep.subr.bf16.mxu1 %v4172_v16  ;;  %v391_v46 = vadd.f32 %v390_v51, %v389_v18  ;;  %v427_v37 = vsel %vm107_vm0, %v4356_v47, 0.0  ;;  %v428_v48 = vsel %vm107_vm0, %v4358_v50, 0.0  ;;  %v5012_v18 = vld [vmem:[#allocation50_spill] sm:$0xff]  ;;  %v5014_v58 = vld [vmem:[#allocation51_spill] sm:$0xff] }
  0xc0   :  { %v430_v2 = vsel %vm107_vm0, %v4364_v63, 0.0  ;;  %v464_v59 = vadd.f32 %v463_v24, %v462_v6  ;;  %v429_v34 = vadd.f32 %v428_v48, %v427_v37  ;;  %v451_v39 = vsel %vm107_vm0, %v371_v15, 0.0  ;;  %v5011_v15 = vld [vmem:[#allocation57_spill] sm:$0xff]  ;;  %v5016_v48 = vld [vmem:[#allocation54_spill] sm:$0xff] }
  0xc1   :  { %v411_v40 = vadd.f32 %v410_v5, %v409_v29  ;;  %v5002_v25 = vand.u32 4294901760, %v5001_v12  ;;  %v452_v47 = vsel %vm107_vm0, %v391_v46, 0.0  ;;  %v1717_v50 = vsub.f32 %v4149_v30, %v1716_v57 }
  0xc2   :  { %2891 = vmatpush3.bf16.msra.mxu0 %v5000_v20  ;;  %v1724_v63 = vsub.f32 %v4154_v53, %v1723_v10  ;;  %2927 = vmatpush3.bf16.msra.mxu1 %v5004_v55  ;;  %v4443_v42 = vand.u32 4294901760, %v464_v59  ;;  %v431_v17 = vadd.f32 %v430_v2, %v429_v34  ;;  %v453_v43 = vadd.f32 %v452_v47, %v451_v39  ;;  %v5023_v55 = vld [vmem:[#allocation29_spill] sm:$0xff] }
  0xc3   :  { %v2930_v16 = vpack.c.bf16 %v1599_v11, %v5002_v25  ;;  %2893 = vmatprep.subr.bf16.mxu0 %v5003_v19  ;;  %v454_v3 = vsel %vm107_vm0, %v411_v40, 0.0  ;;  %v5005_v11 = vld [vmem:[#allocation7_spill] sm:$0xff]  ;;  %v1718_v8 = vand.u32 4294901760, %v1717_v50  ;;  %v1605_v60 = vsub.f32 %v4159_v23, %v1604_v45  ;;  %v5020_v25 = vld [vmem:[#allocation4_spill] sm:$0xff] }
  0xc4   :  { %2929 = vmatprep.subr.bf16.mxu1 %v5005_v11  ;;  %v1725_v4 = vand.u32 4294901760, %v1724_v63  ;;  %v1612_v1 = vsub.f32 %v4197_v22, %v1611_v28  ;;  %v1488_v52 = vsub.f32 %v464_v59, %v4443_v42  ;;  %v455_v36 = vadd.f32 %v454_v3, %v453_v43  ;;  %1728 = vmatprep.mubr.f32.mxu1 %v4443_v42  ;;  %v5018_v59 = vld [vmem:[#allocation56_spill] sm:$0xff]  ;;  %v5024_v43 = vld [vmem:[#allocation41_spill] sm:$0xff]  ;;  %v5026_v11 = vld [vmem:[#allocation42_spill] sm:$0xff] }
  0xc5   :  { %v456_v33 = vsel %vm107_vm0, %v431_v17, 0.0  ;;  %v5008_v21 = vand.u32 4294901760, %v5007_v32  ;;  %v5010_v49 = vand.u32 4294901760, %v5009_v0  ;;  %v1606_v41 = vand.u32 4294901760, %v1605_v60  ;;  %v5022_v63 = vld [vmem:[#allocation28_spill] sm:$0xff]  ;;  %v5028_v60 = vld [vmem:[#allocation25_spill] sm:$0xff] }
  0xc6   :  { %2895 = vmatpush3.bf16.msra.mxu0 %v5006_v62  ;;  %v2932_v54 = vpack.c.bf16 %v1725_v4, %v1718_v8  ;;  %v1613_v13 = vand.u32 4294901760, %v1612_v1  ;;  %v5013_v51 = vand.u32 4294901760, %v5012_v18  ;;  %v5015_v9 = vand.u32 4294901760, %v5014_v58  ;;  %2931 = vmatpush3.bf16.msra.mxu1 %v2930_v16  ;;  %v5021_v16 = vld [vmem:[#allocation27_spill] sm:$0xff]  ;;  %v5032_v0 = vld [vmem:[#allocation46_spill] sm:$0xff]  ;;  %v5036_v18 = vld [vmem:[#allocation52_spill] sm:$0xff] }
  0xc7   :  { %v4461_v31 = vpack.c.bf16 %v5010_v49, %v5008_v21  ;;  %2897 = vmatprep.subr.bf16.mxu0 %v5011_v15  ;;  %v1489_v24 = vand.u32 4294901760, %v1488_v52  ;;  %v457_v29 = vadd.f32 %v456_v33, %v455_v36  ;;  %v5017_v2 = vand.u32 4294901760, %v5016_v48  ;;  %v5030_v36 = vld [vmem:[#allocation45_spill] sm:$0xff]  ;;  %v5042_v48 = vld [vmem:[#allocation58_spill] sm:$0xff] }
  0xc8   :  { %v4468_v6 = vpack.c.bf16 %v5015_v9, %v5013_v51  ;;  %2933 = vmatprep.subr.bf16.mxu1 %v2932_v54  ;;  %v2934_v5 = vpack.c.bf16 %v1613_v13, %v1606_v41  ;;  %v5019_v40 = vand.u32 4294901760, %v5018_v59  ;;  %v2936_v47 = vpack.c.bf16 %v5021_v16, %v5020_v25  ;;  %v5034_v54 = vld [vmem:[#allocation48_spill] sm:$0xff]  ;;  %v5038_v58 = vld [vmem:[#allocation53_spill] sm:$0xff] }
  0xc9   :  { %v1490_v46 = vsub.f32 %v1488_v52, %v1489_v24  ;;  %v4470_v37 = vand.u32 4294901760, %v457_v29  ;;  %v2938_v17 = vpack.c.bf16 %v5023_v55, %v5022_v63  ;;  %v5025_v3 = vand.u32 4294901760, %v5024_v43 }
  0xca   :  { %2899 = vmatpush3.bf16.msra.mxu0 %v4461_v31  ;;  %v4477_v34 = vpack.c.bf16 %v5019_v40, %v5017_v2  ;;  %2935 = vmatpush3.bf16.msra.mxu1 %v2934_v5  ;;  %v5027_v8 = vand.u32 4294901760, %v5026_v11  ;;  %v5029_v1 = vand.u32 4294901760, %v5028_v60  ;;  %v5031_v33 = vand.u32 4294901760, %v5030_v36  ;;  %v5040_v5 = vld [vmem:[#allocation55_spill] sm:$0xff] }
  0xcb   :  { %2901 = vmatprep.subr.bf16.mxu0 %v4468_v6  ;;  %v1491_v39 = vand.u32 4294901760, %v1490_v46  ;;  %v4481_v12 = vsub.f32 %v457_v29, %v4470_v37  ;;  %2969 = vmatprep.subr.bf16.mxu1 %v4996_v7  ;;  %v5033_v49 = vand.u32 4294901760, %v5032_v0  ;;  %v5035_v41 = vand.u32 4294901760, %v5034_v54 }
  0xcc   :  { %v4495_v4 = vpack.c.bf16 %v5027_v8, %v5025_v3  ;;  %v4501_v32 = vpack.c.bf16 %v5031_v33, %v5029_v1  ;;  %v5037_v51 = vand.u32 4294901760, %v5036_v18  ;;  %v5039_v9 = vand.u32 4294901760, %v5038_v58  ;;  %v5045_v3 = vld [vmem:[#allocation34_spill] sm:$0xff]  ;;  %v5046_v1 = vld [vmem:[#allocation35_spill] sm:$0xff]  ;;  %v5047_v33 = vld [vmem:[#allocation36_spill] sm:$0xff] }
  0xcd   :  { %1492 = vmatprep.mubr.f32.mxu0 %v1491_v39  ;;  %v1495_v50 = vand.u32 4294901760, %v4481_v12  ;;  %1730 = vmatmul.mubr.f32.vlgmr.msra.gmra.mrb[6].mxu1 %v4470_v37  ;;  %v4509_v13 = vpack.c.bf16 %v5035_v41, %v5033_v49  ;;  %v5041_v46 = vand.u32 4294901760, %v5040_v5  ;;  %v5043_v2 = vand.u32 4294901760, %v5042_v48 }
  0xce   :  { %2903 = vmatpush3.bf16.msra.mxu0 %v4477_v34  ;;  %2971 = vmatpush3.bf16.msra.mxu1 %v4997_v14  ;;  %v4515_v29 = vpack.c.bf16 %v5039_v9, %v5037_v51  ;;  %v4528_v40 = vpack.c.bf16 %v1723_v10, %v1716_v57  ;;  %v4534_v39 = vpack.c.bf16 %v1611_v28, %v1604_v45  ;;  %v5048_v57 = vld [vmem:[#allocation11_spill] sm:$0xff]  ;;  %v5049_v10 = vld [vmem:[#allocation14_spill] sm:$0xff]  ;;  %v5050_v45 = vld [vmem:[#allocation37_spill] sm:$0xff] }
  0xcf   :  { %v1496_v21 = vsub.f32 %v4481_v12, %v1495_v50  ;;  %2937 = vmatprep.subr.bf16.mxu0 %v2936_v47  ;;  %2973 = vmatprep.subr.bf16.mxu1 %v3834_v35  ;;  %v4522_v59 = vpack.c.bf16 %v5043_v2, %v5041_v46  ;;  %v2942_v49 = vpack.c.bf16 %v5047_v33, %v5046_v1  ;;  %v5051_v28 = vld [vmem:[#allocation16_spill] sm:$0xff]  ;;  %v5053_v51 = vld [vmem:[#allocation18_spill] sm:$0xff]  ;;  %v5055_v2 = vld [vmem:[#allocation19_spill] sm:$0xff] }
  0xd0   :  { %1972 = vmatprep.mubr.f32.mxu1 %v1489_v24  ;;  %v5044_v24 = vld [vmem:[#allocation33_spill] sm:$0xff]  ;;  %v2944_v41 = vpack.c.bf16 %v5049_v10, %v5048_v57  ;;  %v5054_v46 = vld [vmem:[#allocation38_spill] sm:$0xff] }
  0xd1   :  { %v1497_v47 = vand.u32 4294901760, %v1496_v21  ;;  %v2940_v8 = vpack.c.bf16 %v5045_v3, %v5044_v24  ;;  %v2946_v21 = vpack.c.bf16 %v5051_v28, %v5050_v45 }
  0xd2   :  { %2975 = vmatpush3.bf16.msra.mxu1 %v3836_v26 }
  0xd3   :  { %1498 = vmatmul.mubr.f32.vlgmr.msra.gmra.mrb[6].mxu0 %v1497_v47  ;;  %2977 = vmatprep.subr.bf16.mxu1 %v3838_v56  ;;  %v2950_v47 = vpack.c.bf16 %v5055_v2, %v5054_v46 }
  0xd4   :  { %2939 = vmatpush3.bf16.msra.mxu0 %v2938_v17  ;;  %1865 = vmatprep.mubr.f32.mxu0 %v1488_v52  ;;  %v5052_v17 = vld [vmem:[#allocation17_spill] sm:$0xff]  ;;  %v5056_v52 = vld [vmem:[#allocation40_spill] sm:$0xff] }
  0xd5   :  { %2941 = vmatprep.subr.bf16.mxu0 %v2940_v8  ;;  %v2948_v9 = vpack.c.bf16 %v5053_v51, %v5052_v17  ;;  %v5057_v8 = vld [vmem:[#allocation21_spill] sm:$0xff] }
  0xd6   :  { %2979 = vmatpush3.bf16.msra.mxu1 %v3860_v38 }
  0xd7   :  { %2981 = vmatprep.subr.bf16.mxu1 %v3897_v44 }
  0xd8   :  { %2943 = vmatpush3.bf16.msra.mxu0 %v2942_v49  ;;  %v2952_v49 = vpack.c.bf16 %v5057_v8, %v5056_v52 }
  0xd9   :  { %2945 = vmatprep.subr.bf16.mxu0 %v2944_v41  ;;  %v2954_v41 = vpack.c.bf16 %v5026_v11, %v5024_v43  ;;  %v2962_v43 = vpack.c.bf16 %v5042_v48, %v5040_v5  ;;  %v2964_v11 = vpack.c.bf16 %v4154_v53, %v4149_v30  ;;  %v5060_v30 = vand.u32 4294901760, %v5022_v63 }
  0xda   :  { %2983 = vmatpush3.bf16.msra.mxu1 %v4998_v61  ;;  %v5061_v53 = vand.u32 4294901760, %v5023_v55 }
  0xdb   :  { %2985 = vmatprep.subr.bf16.mxu1 %v4999_v27 }
  0xdc   :  { %2947 = vmatpush3.bf16.msra.mxu0 %v2946_v21  ;;  %v2956_v21 = vpack.c.bf16 %v5030_v36, %v5028_v60  ;;  %v2966_v60 = vpack.c.bf16 %v4197_v22, %v4159_v23  ;;  %v5058_v36 = vand.u32 4294901760, %v5020_v25  ;;  %v5062_v22 = vand.u32 4294901760, %v5044_v24 }
  0xdd   :  { %2949 = vmatprep.subr.bf16.mxu0 %v2948_v9  ;;  %v2958_v9 = vpack.c.bf16 %v5034_v54, %v5032_v0  ;;  %v5059_v0 = vand.u32 4294901760, %v5021_v16  ;;  %v5063_v23 = vand.u32 4294901760, %v5045_v3  ;;  %v5065_v25 = vand.u32 4294901760, %v5047_v33 }
  0xde   :  { %2987 = vmatpush3.bf16.msra.mxu1 %v5000_v20  ;;  %v5074_v24 = vand.u32 4294901760, %v5056_v52 }
  0xdf   :  { %2989 = vmatprep.subr.bf16.mxu1 %v5003_v19  ;;  %v3000_v54 = vpack.c.bf16 %v5059_v0, %v5058_v36 }
  0xe0   :  { %2951 = vmatpush3.bf16.msra.mxu0 %v2950_v47  ;;  %v2960_v47 = vpack.c.bf16 %v5038_v58, %v5036_v18  ;;  %v3002_v18 = vpack.c.bf16 %v5061_v53, %v5060_v30  ;;  %v5071_v58 = vand.u32 4294901760, %v5053_v51 }
  0xe1   :  { %2953 = vmatprep.subr.bf16.mxu0 %v2952_v49 }
  0xe2   :  { %2991 = vmatpush3.bf16.msra.mxu1 %v5006_v62 }
  0xe3   :  { %2993 = vmatprep.subr.bf16.mxu1 %v5011_v15 }
  0xe4   :  { %2955 = vmatpush3.bf16.msra.mxu0 %v2954_v41 }
  0xe5   :  { %2957 = vmatprep.subr.bf16.mxu0 %v2956_v21 }
  0xe6   :  { %2995 = vmatpush3.bf16.msra.mxu1 %v4461_v31 }
  0xe7   :  { %2997 = vmatprep.subr.bf16.mxu1 %v4468_v6 }
  0xe8   :  { %2959 = vmatpush3.bf16.msra.mxu0 %v2958_v9 }
  0xe9   :  { %2961 = vmatprep.subr.bf16.mxu0 %v2960_v47 }
  0xea   :  { %2999 = vmatpush3.bf16.msra.mxu1 %v4477_v34 }
  0xeb   :  { %3033 = vmatprep.subr.bf16.mxu1 %v4996_v7  ;;  %v3004_v7 = vpack.c.bf16 %v5063_v23, %v5062_v22 }
  0xec   :  { %2963 = vmatpush3.bf16.msra.mxu0 %v2962_v43 }
  0xed   :  { %2965 = vmatprep.subr.bf16.mxu0 %v2964_v11  ;;  %1976 = vmatmul.mubr.f32.vlgmr.msra.gmra.mrb[8].mxu1 %v1495_v50  ;;  %v5067_v50 = vand.u32 4294901760, %v5049_v10 }
  0xee   :  { %3035 = vmatpush3.bf16.msra.mxu1 %v4997_v14  ;;  %2246 = vmatprep.mubr.f32.mxu1 %v4443_v42  ;;  %v5064_v14 = vand.u32 4294901760, %v5046_v1 }
  0xef   :  { %3037 = vmatprep.subr.bf16.mxu1 %v3834_v35  ;;  %v5066_v35 = vand.u32 4294901760, %v5048_v57 }
  0xf0   :  { %2967 = vmatpush3.bf16.msra.mxu0 %v2966_v60  ;;  %v3006_v16 = vpack.c.bf16 %v5065_v25, %v5064_v14 }
  0xf1   :  { %3001 = vmatprep.subr.bf16.mxu0 %v3000_v54  ;;  %v3008_v63 = vpack.c.bf16 %v5067_v50, %v5066_v35 }
  0xf2   :  { %3039 = vmatpush3.bf16.msra.mxu1 %v3836_v26  ;;  %v5068_v26 = vand.u32 4294901760, %v5050_v45 }
  0xf3   :  { %1868 = vmatmul.mubr.f32.vlgmr.msra.gmra.mrb[8].mxu0 %v4481_v12  ;;  %3041 = vmatprep.subr.bf16.mxu1 %v3838_v56  ;;  %v5069_v12 = vand.u32 4294901760, %v5051_v28  ;;  %v5070_v56 = vand.u32 4294901760, %v5052_v17 }
  0xf4   :  { %3003 = vmatpush3.bf16.msra.mxu0 %v3002_v18  ;;  %2142 = vmatprep.mubr.f32.mxu0 %v4443_v42  ;;  %v5072_v42 = vand.u32 4294901760, %v5054_v46 }
  0xf5   :  { %3005 = vmatprep.subr.bf16.mxu0 %v3004_v7  ;;  %v3010_v55 = vpack.c.bf16 %v5069_v12, %v5068_v26  ;;  %v3012_v5 = vpack.c.bf16 %v5071_v58, %v5070_v56 }
  0xf6   :  { %3043 = vmatpush3.bf16.msra.mxu1 %v3860_v38  ;;  %v5073_v38 = vand.u32 4294901760, %v5055_v2 }
  0xf7   :  { %3045 = vmatprep.subr.bf16.mxu1 %v3897_v44  ;;  %v5075_v44 = vand.u32 4294901760, %v5057_v8 }
  0xf8   :  { %3007 = vmatpush3.bf16.msra.mxu0 %v3006_v16  ;;  %v3014_v48 = vpack.c.bf16 %v5073_v38, %v5072_v42 }
  0xf9   :  { %3009 = vmatprep.subr.bf16.mxu0 %v3008_v63  ;;  %v3016_v3 = vpack.c.bf16 %v5075_v44, %v5074_v24 }
  0xfa   :  { %3047 = vmatpush3.bf16.msra.mxu1 %v4998_v61 }
  0xfb   :  { %3049 = vmatprep.subr.bf16.mxu1 %v4999_v27 }
  0xfc   :  { %3011 = vmatpush3.bf16.msra.mxu0 %v3010_v55 }
  0xfd   :  { %3013 = vmatprep.subr.bf16.mxu0 %v3012_v5 }
  0xfe   :  { %3051 = vmatpush3.bf16.msra.mxu1 %v5000_v20 }
  0xff   :  { %3053 = vmatprep.subr.bf16.mxu1 %v5003_v19 }
 0x100   :  { %3015 = vmatpush3.bf16.msra.mxu0 %v3014_v48 }
 0x101   :  { %3017 = vmatprep.subr.bf16.mxu0 %v3016_v3 }
 0x102   :  { %3055 = vmatpush3.bf16.msra.mxu1 %v5006_v62 }
 0x103   :  { %3057 = vmatprep.subr.bf16.mxu1 %v5011_v15 }
 0x104   :  { %3019 = vmatpush3.bf16.msra.mxu0 %v4495_v4 }
 0x105   :  { %3021 = vmatprep.subr.bf16.mxu0 %v4501_v32 }
 0x106   :  { %3059 = vmatpush3.bf16.msra.mxu1 %v4461_v31 }
 0x107   :  { %3061 = vmatprep.subr.bf16.mxu1 %v4468_v6 }
 0x108   :  { %3023 = vmatpush3.bf16.msra.mxu0 %v4509_v13 }
 0x109   :  { %3025 = vmatprep.subr.bf16.mxu0 %v4515_v29 }
 0x10a   :  { %3063 = vmatpush3.bf16.msra.mxu1 %v4477_v34 }
 0x10c   :  { %3027 = vmatpush3.bf16.msra.mxu0 %v4522_v59 }
 0x10d   :  { %3029 = vmatprep.subr.bf16.mxu0 %v4528_v40  ;;  %2248 = vmatmul.mubr.f32.vlgmr.msra.gmra.mrb[10].mxu1 %v4470_v37 }
 0x110   :  { %3031 = vmatpush3.bf16.msra.mxu0 %v4534_v39 }
 0x113   :  { %2144 = vmatmul.mubr.f32.vlgmr.msra.gmra.mrb[10].mxu0 %v4470_v37 }
 0x135   :  { %v2327_v61 = vpop.f32.mrb[0].mxu1 }
 0x136   :  { %v2328_v27 = vpop.f32.mrb[1].mxu1 }
 0x137   :  { %v2329_v20 = vadd.f32 %v2328_v27, %v2327_v61 }
 0x13c   :  { %v2292_v19 = vpop.f32.mrb[0].mxu0 }
 0x13d   :  { %v2293_v62 = vpop.f32.mrb[1].mxu0 }
 0x13e   :  { %v2294_v31 = vadd.f32 %v2293_v62, %v2292_v19 }
 0x140   :  { %v870_v15 = vadd.f32 %v2329_v20, %v2294_v31 }
 0x160   :  { %v2397_v6 = vpop.f32.mrb[2].mxu1 }
 0x161   :  { %v2398_v4 = vpop.f32.mrb[3].mxu1 }
 0x162   :  { %v2399_v34 = vadd.f32 %v2398_v4, %v2397_v6 }
 0x163   :  { %v2362_v32 = vpop.f32.mrb[2].mxu0 }
 0x164   :  { %v2363_v13 = vpop.f32.mrb[3].mxu0 }
 0x165   :  { %v2364_v29 = vadd.f32 %v2363_v13, %v2362_v32 }
 0x167   :  { %v1008_v59 = vadd.f32 %v2364_v29, %v870_v15 }
 0x169   :  { %v1116_v40 = vadd.f32 %v2399_v34, %v1008_v59 }
 0x180   :  { %v2467_v1 = vpop.f32.mrb[4].mxu1 }
 0x181   :  { %v2468_v33 = vpop.f32.mrb[5].mxu1 }
 0x182   :  { %v2469_v39 = vadd.f32 %v2468_v33, %v2467_v1 }
 0x184   :  { %v2432_v57 = vpop.f32.mrb[4].mxu0 }
 0x185   :  { %v2433_v37 = vpop.f32.mrb[5].mxu0 }
 0x186   :  { %v2434_v10 = vadd.f32 %v2433_v37, %v2432_v57 }
 0x188   :  { %v1284_v45 = vadd.f32 %v2434_v10, %v1116_v40 }
 0x18a   :  { %v1388_v28 = vadd.f32 %v2469_v39, %v1284_v45 }
 0x1a0   :  { %v2537_v17 = vpop.f32.mrb[6].mxu1 }
 0x1a1   :  { %v2538_v51 = vpop.f32.mrb[7].mxu1 }
 0x1a2   :  { %v2539_v46 = vadd.f32 %v2538_v51, %v2537_v17 }
 0x1a6   :  { %v2502_v2 = vpop.f32.mrb[6].mxu0 }
 0x1a7   :  { %v2503_v52 = vpop.f32.mrb[7].mxu0 }
 0x1a8   :  { %v2504_v8 = vadd.f32 %v2503_v52, %v2502_v2 }
 0x1aa   :  { %v1500_v49 = vadd.f32 %v2504_v8, %v1388_v28 }
 0x1ac   :  { %v1732_v41 = vadd.f32 %v2539_v46, %v1500_v49 }
 0x1c0   :  { %v2607_v21 = vpop.f32.mrb[8].mxu1 }
 0x1c1   :  { %v2608_v9 = vpop.f32.mrb[9].mxu1 }
 0x1c2   :  { %v2609_v47 = vadd.f32 %v2608_v9, %v2607_v21 }
 0x1c6   :  { %v2572_v43 = vpop.f32.mrb[8].mxu0 }
 0x1c7   :  { %v2573_v11 = vpop.f32.mrb[9].mxu0 }
 0x1c8   :  { %v2574_v60 = vadd.f32 %v2573_v11, %v2572_v43 }
 0x1ca   :  { %v1870_v36 = vadd.f32 %v2574_v60, %v1732_v41 }
 0x1cc   :  { %v1978_v0 = vadd.f32 %v2609_v47, %v1870_v36 }
 0x1e0   :  { %v2677_v54 = vpop.f32.mrb[10].mxu1 }
 0x1e1   :  { %v2678_v30 = vpop.f32.mrb[11].mxu1 }
 0x1e2   :  { %v2679_v53 = vadd.f32 %v2678_v30, %v2677_v54 }
 0x1e6   :  { %v2642_v18 = vpop.f32.mrb[10].mxu0 }
 0x1e7   :  { %v2643_v22 = vpop.f32.mrb[11].mxu0 }
 0x1e8   :  { %v2644_v23 = vadd.f32 %v2643_v22, %v2642_v18 }
 0x1ea   :  { %v2146_v7 = vadd.f32 %v2644_v23, %v1978_v0 }
 0x1ec   :  { %v2250_v14 = vadd.f32 %v2679_v53, %v2146_v7 }
 0x1ee   :  { %v2253_v25 = vmul.f32 0.0625, %v2250_v14 }
 0x1f0   :  { %2255 = vst.msk [vmem:[%s4646_s2] sm:$0xf] %vm2254_vm1, %v2253_v25 }

</bundles_post_ra>
